<compile_context>
chip_gen: v7x
topology: tpu7x:2x2x1
jax: 0.10.0
libtpu: 0.0.40
codegen_flags: <defaults>
</compile_context>

<pallas_src>
import functools

import jax
import jax.numpy as jnp
from jax.experimental import pallas as pl
from jax.experimental.pallas import tpu as pltpu

IGNORE = 255
SMOOTH_FACTOR = 0.05      # SoftCrossEntropyLoss(smooth_factor=0.05)
DICE_SMOOTH = 0.05        # DiceLoss(smooth=0.05)
DICE_EPS = 1e-7           # DiceLoss default eps
MAX_TILE = 32768          # pixels per lane tile (multiple of 128)
VMEM_BUDGET = 24 * 1024 * 1024   # working-set budget used to shrink the tile
VMEM_LIMIT = 32 * 1024 * 1024    # scoped VMEM limit requested from Mosaic


def _round_up(x, m):
    return (x + m - 1) // m * m


def _pick_tile(hw, c, n_heads):
    """Largest lane tile (multiple of 128) whose per-step working set fits."""
    cp = _round_up(c, 8)
    # padded label double-buffer + double-buffered logits per head + ~6
    # compiler-managed (C,tile) f32 temporaries per step.
    per_pix = 4 * (2 * 8 + n_heads * 2 * cp + 6 * cp)
    tile = MAX_TILE
    while tile > 1024 and tile * per_pix > VMEM_BUDGET:
        tile //= 2
    return min(tile, _round_up(hw, 128))


def _stats_kernel(hw, tile, n_tps, with_aux, needs_guard, lbl_ref, *refs):
    """Accumulate SCE + Dice statistics over (C, tile) pixel tiles."""
    if with_aux:
        (xm_ref, xa_ref, out_ref,
         inter_acc, sump_acc, cnt_acc,
         nllm_acc, smm_acc, nlla_acc, sma_acc) = refs
    else:
        (xm_ref, out_ref,
         inter_acc, sump_acc, cnt_acc,
         nllm_acc, smm_acc) = refs
        xa_ref = nlla_acc = sma_acc = None

    C = xm_ref.shape[0]
    cp = _round_up(C, 8)
    s = pl.program_id(1)
    t = pl.program_id(2)

    @pl.when(t == 0)
    def _init():
        inter_acc[...] = jnp.zeros_like(inter_acc)
        sump_acc[...] = jnp.zeros_like(sump_acc)
        cnt_acc[...] = jnp.zeros_like(cnt_acc)
        nllm_acc[...] = jnp.zeros_like(nllm_acc)
        smm_acc[...] = jnp.zeros_like(smm_acc)
        if with_aux:
            nlla_acc[...] = jnp.zeros_like(nlla_acc)
            sma_acc[...] = jnp.zeros_like(sma_acc)

    # ---- validity mask & one-hot from lane-dense labels --------------------
    g_t = s * n_tps + t                                          # intended block
    lbl = lbl_ref[...]                                           # (1, tile) i32
    pix = g_t * tile + jax.lax.broadcasted_iota(jnp.int32, (1, tile), 1)
    pix_ok = pix < hw                                            # (1, tile)
    valid_b = jnp.logical_and(lbl != IGNORE, pix_ok)             # (1, tile)
    validf = valid_b.astype(jnp.float32)
    # Sentinel one-hot: invalid / out-of-image lanes get label -1, which never
    # matches a class index -> onehot is already masked (no extra multiply).
    lbl_eff = jnp.where(valid_b, lbl, -1)
    cls = jax.lax.broadcasted_iota(jnp.int32, (C, tile), 0)
    onehot = (cls == lbl_eff).astype(jnp.float32)                # (C, tile)

    def head_stats(x_ref, sanitize):
        x = x_ref[...].astype(jnp.float32)                       # (C, tile)
        if sanitize:
            # Only traced in when the last block extends past H*W: the un-DMA'd
            # tail of the buffer can hold NaN/Inf garbage that would otherwise
            # leak into the cross-lane Dice reductions through p.
            x = jnp.where(pix_ok, x, 0.0)
        m = jnp.max(x, axis=0, keepdims=True)                    # (1, tile)
        z = x - m
        e = jnp.exp(z)                                           # single exp pass
        denom = jnp.sum(e, axis=0, keepdims=True)                # (1, tile)
        lse = jnp.log(denom)
        z_true = jnp.sum(z * onehot, axis=0, keepdims=True)
        z_sum = jnp.sum(z, axis=0, keepdims=True)
        # Selects (not multiplies) so padding NaNs never propagate.
        nll = jnp.where(valid_b, lse - z_true, 0.0)              # (1, tile)
        sm = jnp.where(valid_b, float(C) * lse - z_sum, 0.0)     # (1, tile)
        return nll, sm, e, denom

    # ---- main head: SCE + Dice statistics -----------------------------------
    nll_m, sm_m, e_m, den_m = head_stats(xm_ref, needs_guard)
    # fold the validity mask into the (1,tile) reciprocal -> p is pre-masked
    inv = pl.reciprocal(den_m, approx=False) * validf
    p = e_m * inv                                                # (C, tile)
    # lane-fold each contribution into fixed-width accumulators (no big RMW)
    inter_acc[...] += jnp.sum(p * onehot, axis=1, keepdims=True)   # (C, 1)
    sump_acc[...] += jnp.sum(p, axis=1, keepdims=True)             # (C, 1)
    cnt_acc[...] += jnp.sum(onehot, axis=1, keepdims=True)         # (C, 1)
    nllm_acc[...] += jnp.sum(nll_m, axis=1, keepdims=True)         # (1, 1)
    smm_acc[...] += jnp.sum(sm_m, axis=1, keepdims=True)           # (1, 1)

    # ---- aux head: SCE statistics only ---------------------------------------
    if with_aux:
        nll_a, sm_a, _, _ = head_stats(xa_ref, False)
        nlla_acc[...] += jnp.sum(nll_a, axis=1, keepdims=True)
        sma_acc[...] += jnp.sum(sm_a, axis=1, keepdims=True)

    # ---- once per (image, half): write the packed lane-dense stats block ----
    @pl.when(t == pl.num_programs(2) - 1)
    def _finalize():
        out_ref[...] = jnp.zeros(out_ref.shape, jnp.float32)
        out_ref[0:C, 0:1] = inter_acc[...]
        out_ref[cp:cp + C, 0:1] = sump_acc[...]
        out_ref[2 * cp:2 * cp + C, 0:1] = cnt_acc[...]
        out_ref[3 * cp:3 * cp + 1, 0:1] = nllm_acc[...]
        out_ref[3 * cp + 1:3 * cp + 2, 0:1] = smm_acc[...]
        if with_aux:
            out_ref[3 * cp + 2:3 * cp + 3, 0:1] = nlla_acc[...]
            out_ref[3 * cp + 3:3 * cp + 4, 0:1] = sma_acc[...]


def _compute_stats(labels_nhw, logit_main, logit_aux=None, max_tile=None):
    """Run the fused stats kernel; returns one packed partial block per (n, half)."""
    N, C, H, W = logit_main.shape
    HW = H * W
    with_aux = logit_aux is not None
    n_heads = 2 if with_aux else 1

    tile = _pick_tile(HW, C, n_heads)
    if max_tile is not None:
        tile = min(tile, max_tile)                     # must stay a multiple of 128
    n_blocks = (HW + tile - 1) // tile
    n_split = 2 if n_blocks >= 2 else 1                # v7x megacore pixel split
    n_tps = (n_blocks + n_split - 1) // n_split
    needs_guard = (HW % tile) != 0                     # last block has a garbage tail
    cp = _round_up(C, 8)
    rows = 3 * cp + 8                                  # packed stats rows (lane-dense)

    # Free reshapes only — no transpose, no host-side dtype cast of the logits.
    lbl = labels_nhw.reshape(N, 1, HW).astype(jnp.int32)
    xm = logit_main.reshape(N, C, HW)

    last_blk = n_blocks - 1

    def data_idx(n, s, t):
        # clamp phantom blocks of the second half; the in-kernel pix<HW mask
        # (based on the *unclamped* index) zeroes their contributions.
        return (n, 0, jnp.minimum(s * n_tps + t, last_blk))

    def out_idx(n, s, t):
        return (n, s, 0, 0)

    inputs = [lbl, xm]
    in_specs = [pl.BlockSpec((None, 1, tile), data_idx),
                pl.BlockSpec((None, C, tile), data_idx)]
    if with_aux:
        xa = logit_aux.reshape(N, C, HW)
        inputs.append(xa)
        in_specs.append(pl.BlockSpec((None, C, tile), data_idx))

    out_shape = jax.ShapeDtypeStruct((N, n_split, rows, 128), jnp.float32)
    out_spec = pl.BlockSpec((None, None, rows, 128), out_idx)

    scratch = [pltpu.VMEM((C, 1), jnp.float32),   # intersection
               pltpu.VMEM((C, 1), jnp.float32),   # sum of probs
               pltpu.VMEM((C, 1), jnp.float32),   # true-pixel count
               pltpu.VMEM((1, 1), jnp.float32),   # nll (main)
               pltpu.VMEM((1, 1), jnp.float32)]   # smooth (main)
    if with_aux:
        scratch += [pltpu.VMEM((1, 1), jnp.float32),   # nll (aux)
                    pltpu.VMEM((1, 1), jnp.float32)]   # smooth (aux)

    kernel = functools.partial(_stats_kernel, HW, tile, n_tps, with_aux,
                               needs_guard)
    packed = pl.pallas_call(
        kernel,
        out_shape=out_shape,
        grid_spec=pltpu.PrefetchScalarGridSpec(
            num_scalar_prefetch=0,
            grid=(N, n_split, n_tps),
            in_specs=in_specs,
            out_specs=out_spec,
            scratch_shapes=scratch),
        compiler_params=pltpu.CompilerParams(
            dimension_semantics=("parallel", "parallel", "arbitrary"),
            vmem_limit_bytes=VMEM_LIMIT),
    )(*inputs)
    return packed


# --------------------------- tiny JAX finalization ---------------------------
def _finalize_losses(packed, C, N, H, W, with_aux):
    cp = _round_up(C, 8)
    v = jnp.sum(packed[:, :, :, 0], axis=(0, 1))      # (rows,)
    inter = v[0:C]
    sump = v[cp:cp + C]
    cnt = v[2 * cp:2 * cp + C]
    total = float(N * H * W)

    def sce(nll_sum, sm_sum):
        # smp label_smoothed_nll_loss: mean over ALL pixels (ignored ones zeroed)
        return ((1.0 - SMOOTH_FACTOR) * nll_sum / total
                + (SMOOTH_FACTOR / C) * sm_sum / total)

    card = sump + cnt                                 # sum(p) + sum(onehot)
    score = (2.0 * inter + DICE_SMOOTH) / jnp.maximum(card + DICE_SMOOTH, DICE_EPS)
    dice = ((1.0 - score) * (cnt > 0).astype(jnp.float32)).mean()

    main = sce(v[3 * cp], v[3 * cp + 1]) + dice
    if with_aux:
        aux = sce(v[3 * cp + 2], v[3 * cp + 3])
        return main + 0.4 * aux
    return main


def gdgnet_loss(logits, labels, training=True, max_tile=None):
    """GDGNetLoss.forward: JointLoss(SCE+Dice)(main) + 0.4 * SCE(aux)."""
    if training and isinstance(logits, (tuple, list)) and len(logits) == 2:
        logit_main, logit_aux = logits
        N, C, H, W = logit_main.shape
        packed = _compute_stats(labels, logit_main, logit_aux, max_tile=max_tile)
        return _finalize_losses(packed, C, N, H, W, True)

    logit_main = logits[0] if isinstance(logits, (tuple, list)) else logits
    N, C, H, W = logit_main.shape
    packed = _compute_stats(labels, logit_main, None, max_tile=max_tile)
    return _finalize_losses(packed, C, N, H, W, False)


# ----------------------------- pure-JAX reference ----------------------------
def _ref_sce(logits, labels):
    N, C, H, W = logits.shape
    lp = jax.nn.log_softmax(logits, axis=1)
    valid = labels != IGNORE
    lbl_safe = jnp.where(valid, labels, 0)
    nll = -jnp.take_along_axis(lp, lbl_safe[:, None], axis=1)[:, 0]
    nll = jnp.where(valid, nll, 0.0)
    sm = -jnp.sum(lp, axis=1)
    sm = jnp.where(valid, sm, 0.0)
    return (1.0 - SMOOTH_FACTOR) * nll.mean() + (SMOOTH_FACTOR / C) * sm.mean()


def _ref_dice(logits, labels):
    N, C, H, W = logits.shape
    p = jax.nn.softmax(logits, axis=1).reshape(N, C, -1)
    y = labels.reshape(N, -1)
    mask = (y != IGNORE).astype(jnp.float32)
    p = p * mask[:, None, :]
    oh = jax.nn.one_hot(jnp.where(mask > 0, y, 0), C, axis=-1)       # (N, HW, C)
    oh = jnp.transpose(oh, (0, 2, 1)) * mask[:, None, :]             # (N, C, HW)
    inter = jnp.sum(p * oh, axis=(0, 2))
    card = jnp.sum(p + oh, axis=(0, 2))
    score = (2.0 * inter + DICE_SMOOTH) / jnp.maximum(card + DICE_SMOOTH, DICE_EPS)
    loss = (1.0 - score) * (oh.sum(axis=(0, 2)) > 0).astype(jnp.float32)
    return loss.mean()


def _ref_gdgnet(logits, labels):
    lm, la = logits
    return (_ref_sce(lm, labels) + _ref_dice(lm, labels)
            + 0.4 * _ref_sce(la, labels))


# --------------------------------- demo ---------------------------------------
if __name__ == "__main__":
    key = jax.random.PRNGKey(0)
    k1, k2, k3, k4 = jax.random.split(key, 4)

    # Case 1: small shapes, H*W not a multiple of 128 -> partial-tile guard path.
    N, C, H, W = 2, 8, 16, 18
    logit_main = jax.random.normal(k1, (N, C, H, W), dtype=jnp.float32)
    logit_aux = jax.random.normal(k2, (N, C, H, W), dtype=jnp.float32)
    labels = jax.random.randint(k3, (N, H, W), 0, C, dtype=jnp.int32)
    labels = jnp.where(jax.random.uniform(k4, (N, H, W)) < 0.1, IGNORE, labels)

    ref = jax.block_until_ready(_ref_gdgnet((logit_main, logit_aux), labels))

    out1 = jax.block_until_ready(gdgnet_loss((logit_main, logit_aux), labels,
                                             training=True))
    assert jnp.allclose(out1, ref, rtol=1e-4, atol=1e-5), (out1, ref)

    # Case 2: force tiny tiles -> multi-block, 2-way pixel split, clamped phantom
    # block, per-(n,half) partial sums.
    out2 = jax.block_until_ready(gdgnet_loss((logit_main, logit_aux), labels,
                                             training=True, max_tile=128))
    assert jnp.allclose(out2, ref, rtol=1e-4, atol=1e-5), (out2, ref)

    # Case 3: eval path (single head, no aux).
    out3 = jax.block_until_ready(gdgnet_loss(logit_main, labels, training=False))
    ref3 = jax.block_until_ready(_ref_sce(logit_main, labels)
                                 + _ref_dice(logit_main, labels))
    assert jnp.allclose(out3, ref3, rtol=1e-4, atol=1e-5), (out3, ref3)

    # Case 4: larger spatial -> full-size 32768-pixel lane tiles, partial last
    # block at full tile width, 2-way megacore split with N=1.
    k5, k6, k7 = jax.random.split(k4, 3)
    N2, C2, H2, W2 = 1, 8, 192, 192
    lm2 = jax.random.normal(k5, (N2, C2, H2, W2), dtype=jnp.float32)
    la2 = jax.random.normal(k6, (N2, C2, H2, W2), dtype=jnp.float32)
    lbl2 = jax.random.randint(k7, (N2, H2, W2), 0, C2, dtype=jnp.int32)
    out4 = jax.block_until_ready(gdgnet_loss((lm2, la2), lbl2, training=True))
    ref4 = jax.block_until_ready(_ref_gdgnet((lm2, la2), lbl2))
    assert jnp.allclose(out4, ref4, rtol=1e-4, atol=1e-5), (out4, ref4)

    print("KERNEL_OK")
</pallas_src>

<mosaic_0001>
module attributes {stable_mosaic.version = 11 : i64} {
  func.func @_stats_kernel(%arg0: i32, %arg1: i32, %arg2: i32, %arg3: memref<1x1x384xi32, #tpu.memory_space<vmem>>, %arg4: memref<1x8x384xf32, #tpu.memory_space<vmem>>, %arg5: memref<1x8x384xf32, #tpu.memory_space<vmem>>, %arg6: memref<1x1x32x128xf32, #tpu.memory_space<vmem>>, %arg7: memref<8x1xf32, #tpu.memory_space<vmem>>, %arg8: memref<8x1xf32, #tpu.memory_space<vmem>>, %arg9: memref<8x1xf32, #tpu.memory_space<vmem>>, %arg10: memref<1x1xf32, #tpu.memory_space<vmem>>, %arg11: memref<1x1xf32, #tpu.memory_space<vmem>>, %arg12: memref<1x1xf32, #tpu.memory_space<vmem>>, %arg13: memref<1x1xf32, #tpu.memory_space<vmem>>) attributes {dimension_semantics = [#tpu.dimension_semantics<parallel>, #tpu.dimension_semantics<parallel>, #tpu.dimension_semantics<arbitrary>], iteration_bounds = array<i64: 2, 1, 1>, scalar_prefetch = 0 : i64, scratch_operands = 7 : i64, tpu.core_type = #tpu.core_type<tc>, window_params = [{transform_indices = @transform_0, window_bounds = array<i64: 1, 1, 384>}, {transform_indices = @transform_1, window_bounds = array<i64: 1, 8, 384>}, {transform_indices = @transform_2, window_bounds = array<i64: 1, 8, 384>}, {transform_indices = @transform_3, window_bounds = array<i64: 1, 1, 32, 128>}]} {
    %c0_i32 = arith.constant 0 : i32
    %0 = arith.cmpi eq, %arg2, %c0_i32 : i32
    %1 = arith.extui %0 : i1 to i32
    %c0_i32_0 = arith.constant 0 : i32
    %2 = arith.cmpi ne, %1, %c0_i32_0 : i32
    scf.if %2 {
      %cst_60 = arith.constant 0.000000e+00 : f32
      %118 = vector.broadcast %cst_60 : f32 to vector<8x1xf32>
      %c0_61 = arith.constant 0 : index
      %c0_62 = arith.constant 0 : index
      %119 = vector.load %arg7[%c0_61, %c0_62] : memref<8x1xf32, #tpu.memory_space<vmem>>, vector<8x1xf32>
      tpu.vector_store %arg7[%c0_61, %c0_62], %118 {strides = array<i32>} : memref<8x1xf32, #tpu.memory_space<vmem>>, vector<8x1xf32>,
      %cst_63 = arith.constant 0.000000e+00 : f32
      %120 = vector.broadcast %cst_63 : f32 to vector<8x1xf32>
      %c0_64 = arith.constant 0 : index
      %c0_65 = arith.constant 0 : index
      %121 = vector.load %arg8[%c0_64, %c0_65] : memref<8x1xf32, #tpu.memory_space<vmem>>, vector<8x1xf32>
      tpu.vector_store %arg8[%c0_64, %c0_65], %120 {strides = array<i32>} : memref<8x1xf32, #tpu.memory_space<vmem>>, vector<8x1xf32>,
      %cst_66 = arith.constant 0.000000e+00 : f32
      %122 = vector.broadcast %cst_66 : f32 to vector<8x1xf32>
      %c0_67 = arith.constant 0 : index
      %c0_68 = arith.constant 0 : index
      %123 = vector.load %arg9[%c0_67, %c0_68] : memref<8x1xf32, #tpu.memory_space<vmem>>, vector<8x1xf32>
      tpu.vector_store %arg9[%c0_67, %c0_68], %122 {strides = array<i32>} : memref<8x1xf32, #tpu.memory_space<vmem>>, vector<8x1xf32>,
      %cst_69 = arith.constant 0.000000e+00 : f32
      %124 = vector.broadcast %cst_69 : f32 to vector<1x1xf32>
      %c0_70 = arith.constant 0 : index
      %c0_71 = arith.constant 0 : index
      %125 = vector.load %arg10[%c0_70, %c0_71] : memref<1x1xf32, #tpu.memory_space<vmem>>, vector<1x1xf32>
      tpu.vector_store %arg10[%c0_70, %c0_71], %124 {strides = array<i32>} : memref<1x1xf32, #tpu.memory_space<vmem>>, vector<1x1xf32>,
      %cst_72 = arith.constant 0.000000e+00 : f32
      %126 = vector.broadcast %cst_72 : f32 to vector<1x1xf32>
      %c0_73 = arith.constant 0 : index
      %c0_74 = arith.constant 0 : index
      %127 = vector.load %arg11[%c0_73, %c0_74] : memref<1x1xf32, #tpu.memory_space<vmem>>, vector<1x1xf32>
      tpu.vector_store %arg11[%c0_73, %c0_74], %126 {strides = array<i32>} : memref<1x1xf32, #tpu.memory_space<vmem>>, vector<1x1xf32>,
      %cst_75 = arith.constant 0.000000e+00 : f32
      %128 = vector.broadcast %cst_75 : f32 to vector<1x1xf32>
      %c0_76 = arith.constant 0 : index
      %c0_77 = arith.constant 0 : index
      %129 = vector.load %arg12[%c0_76, %c0_77] : memref<1x1xf32, #tpu.memory_space<vmem>>, vector<1x1xf32>
      tpu.vector_store %arg12[%c0_76, %c0_77], %128 {strides = array<i32>} : memref<1x1xf32, #tpu.memory_space<vmem>>, vector<1x1xf32>,
      %cst_78 = arith.constant 0.000000e+00 : f32
      %130 = vector.broadcast %cst_78 : f32 to vector<1x1xf32>
      %c0_79 = arith.constant 0 : index
      %c0_80 = arith.constant 0 : index
      %131 = vector.load %arg13[%c0_79, %c0_80] : memref<1x1xf32, #tpu.memory_space<vmem>>, vector<1x1xf32>
      tpu.vector_store %arg13[%c0_79, %c0_80], %130 {strides = array<i32>} : memref<1x1xf32, #tpu.memory_space<vmem>>, vector<1x1xf32>,
    } else {
    }
    %c1_i32 = arith.constant 1 : i32
    %3 = arith.muli %arg1, %c1_i32 : i32
    %4 = arith.addi %3, %arg2 : i32
    %c0 = arith.constant 0 : index
    %c0_1 = arith.constant 0 : index
    %c0_2 = arith.constant 0 : index
    %5 = vector.load %arg3[%c0, %c0_1, %c0_2] : memref<1x1x384xi32, #tpu.memory_space<vmem>>, vector<1x1x384xi32>
    %6 = vector.shape_cast %5 : vector<1x1x384xi32> to vector<1x384xi32>
    %c384_i32 = arith.constant 384 : i32
    %7 = arith.muli %4, %c384_i32 : i32
    %8 = tpu.iota {dimensions = array<i32: 1>} : vector<1x384xi32>
    %9 = vector.broadcast %7 : i32 to vector<1x384xi32>
    %10 = arith.addi %9, %8 : vector<1x384xi32>
    %c288_i32 = arith.constant 288 : i32
    %11 = vector.broadcast %c288_i32 : i32 to vector<1x384xi32>
    %12 = arith.cmpi slt, %10, %11 : vector<1x384xi32>
    %c255_i32 = arith.constant 255 : i32
    %13 = vector.broadcast %c255_i32 : i32 to vector<1x384xi32>
    %14 = arith.cmpi ne, %6, %13 : vector<1x384xi32>
    %15 = arith.andi %14, %12 : vector<1x384xi1>
    %16 = arith.extui %15 : vector<1x384xi1> to vector<1x384xi32>
    %17 = arith.sitofp %16 : vector<1x384xi32> to vector<1x384xf32>
    %c-1_i32 = arith.constant -1 : i32
    %18 = vector.broadcast %c-1_i32 : i32 to vector<1x384xi32>
    %19 = arith.select %15, %6, %18 : vector<1x384xi1>, vector<1x384xi32>
    %20 = tpu.iota {dimensions = array<i32: 0>} : vector<8x384xi32>
    %21 = vector.broadcast %19 : vector<1x384xi32> to vector<8x384xi32>
    %22 = arith.cmpi eq, %20, %21 : vector<8x384xi32>
    %23 = arith.extui %22 : vector<8x384xi1> to vector<8x384xi32>
    %24 = arith.sitofp %23 : vector<8x384xi32> to vector<8x384xf32>
    %c0_3 = arith.constant 0 : index
    %c0_4 = arith.constant 0 : index
    %c0_5 = arith.constant 0 : index
    %25 = vector.load %arg4[%c0_3, %c0_4, %c0_5] : memref<1x8x384xf32, #tpu.memory_space<vmem>>, vector<1x8x384xf32>
    %26 = vector.shape_cast %25 : vector<1x8x384xf32> to vector<8x384xf32>
    %cst = arith.constant 0.000000e+00 : f32
    %27 = vector.shape_cast %12 : vector<1x384xi1> to vector<1x384xi1>
    %28 = vector.broadcast %27 : vector<1x384xi1> to vector<8x384xi1>
    %29 = vector.broadcast %cst : f32 to vector<8x384xf32>
    %30 = arith.select %28, %26, %29 : vector<8x384xi1>, vector<8x384xf32>
    %cst_6 = arith.constant dense<0xFF800000> : vector<384xf32>
    %31 = vector.multi_reduction <maximumf>, %30, %cst_6 [0] : vector<8x384xf32> to vector<384xf32>
    %32 = vector.shape_cast %31 : vector<384xf32> to vector<1x384xf32>
    %33 = vector.broadcast %32 : vector<1x384xf32> to vector<8x384xf32>
    %34 = arith.subf %30, %33 : vector<8x384xf32>
    %35 = math.exp %34 : vector<8x384xf32>
    %cst_7 = arith.constant dense<0.000000e+00> : vector<384xf32>
    %36 = vector.multi_reduction <add>, %35, %cst_7 [0] : vector<8x384xf32> to vector<384xf32>
    %37 = vector.shape_cast %36 : vector<384xf32> to vector<1x384xf32>
    %38 = math.log %37 : vector<1x384xf32>
    %39 = arith.mulf %34, %24 : vector<8x384xf32>
    %cst_8 = arith.constant dense<0.000000e+00> : vector<384xf32>
    %40 = vector.multi_reduction <add>, %39, %cst_8 [0] : vector<8x384xf32> to vector<384xf32>
    %41 = vector.shape_cast %40 : vector<384xf32> to vector<1x384xf32>
    %cst_9 = arith.constant dense<0.000000e+00> : vector<384xf32>
    %42 = vector.multi_reduction <add>, %34, %cst_9 [0] : vector<8x384xf32> to vector<384xf32>
    %43 = vector.shape_cast %42 : vector<384xf32> to vector<1x384xf32>
    %44 = arith.subf %38, %41 : vector<1x384xf32>
    %cst_10 = arith.constant 0.000000e+00 : f32
    %45 = vector.broadcast %cst_10 : f32 to vector<1x384xf32>
    %46 = arith.select %15, %44, %45 : vector<1x384xi1>, vector<1x384xf32>
    %cst_11 = arith.constant 8.000000e+00 : f32
    %47 = vector.broadcast %cst_11 : f32 to vector<1x384xf32>
    %48 = arith.mulf %47, %38 : vector<1x384xf32>
    %49 = arith.subf %48, %43 : vector<1x384xf32>
    %cst_12 = arith.constant 0.000000e+00 : f32
    %50 = vector.broadcast %cst_12 : f32 to vector<1x384xf32>
    %51 = arith.select %15, %49, %50 : vector<1x384xi1>, vector<1x384xf32>
    %52 = tpu.reciprocal %37 : vector<1x384xf32> -> vector<1x384xf32>
    %53 = arith.mulf %52, %17 : vector<1x384xf32>
    %54 = vector.broadcast %53 : vector<1x384xf32> to vector<8x384xf32>
    %55 = arith.mulf %35, %54 : vector<8x384xf32>
    %c0_13 = arith.constant 0 : index
    %c0_14 = arith.constant 0 : index
    %56 = vector.load %arg7[%c0_13, %c0_14] : memref<8x1xf32, #tpu.memory_space<vmem>>, vector<8x1xf32>
    %57 = arith.mulf %55, %24 : vector<8x384xf32>
    %cst_15 = arith.constant dense<0.000000e+00> : vector<8xf32>
    %58 = vector.multi_reduction <add>, %57, %cst_15 [1] : vector<8x384xf32> to vector<8xf32>
    %59 = vector.shape_cast %58 : vector<8xf32> to vector<8x1xf32>
    %60 = arith.addf %56, %59 : vector<8x1xf32>
    %c0_16 = arith.constant 0 : index
    %c0_17 = arith.constant 0 : index
    %61 = vector.load %arg7[%c0_16, %c0_17] : memref<8x1xf32, #tpu.memory_space<vmem>>, vector<8x1xf32>
    tpu.vector_store %arg7[%c0_16, %c0_17], %60 {strides = array<i32>} : memref<8x1xf32, #tpu.memory_space<vmem>>, vector<8x1xf32>,
    %c0_18 = arith.constant 0 : index
    %c0_19 = arith.constant 0 : index
    %62 = vector.load %arg8[%c0_18, %c0_19] : memref<8x1xf32, #tpu.memory_space<vmem>>, vector<8x1xf32>
    %cst_20 = arith.constant dense<0.000000e+00> : vector<8xf32>
    %63 = vector.multi_reduction <add>, %55, %cst_20 [1] : vector<8x384xf32> to vector<8xf32>
    %64 = vector.shape_cast %63 : vector<8xf32> to vector<8x1xf32>
    %65 = arith.addf %62, %64 : vector<8x1xf32>
    %c0_21 = arith.constant 0 : index
    %c0_22 = arith.constant 0 : index
    %66 = vector.load %arg8[%c0_21, %c0_22] : memref<8x1xf32, #tpu.memory_space<vmem>>, vector<8x1xf32>
    tpu.vector_store %arg8[%c0_21, %c0_22], %65 {strides = array<i32>} : memref<8x1xf32, #tpu.memory_space<vmem>>, vector<8x1xf32>,
    %c0_23 = arith.constant 0 : index
    %c0_24 = arith.constant 0 : index
    %67 = vector.load %arg9[%c0_23, %c0_24] : memref<8x1xf32, #tpu.memory_space<vmem>>, vector<8x1xf32>
    %cst_25 = arith.constant dense<0.000000e+00> : vector<8xf32>
    %68 = vector.multi_reduction <add>, %24, %cst_25 [1] : vector<8x384xf32> to vector<8xf32>
    %69 = vector.shape_cast %68 : vector<8xf32> to vector<8x1xf32>
    %70 = arith.addf %67, %69 : vector<8x1xf32>
    %c0_26 = arith.constant 0 : index
    %c0_27 = arith.constant 0 : index
    %71 = vector.load %arg9[%c0_26, %c0_27] : memref<8x1xf32, #tpu.memory_space<vmem>>, vector<8x1xf32>
    tpu.vector_store %arg9[%c0_26, %c0_27], %70 {strides = array<i32>} : memref<8x1xf32, #tpu.memory_space<vmem>>, vector<8x1xf32>,
    %c0_28 = arith.constant 0 : index
    %c0_29 = arith.constant 0 : index
    %72 = vector.load %arg10[%c0_28, %c0_29] : memref<1x1xf32, #tpu.memory_space<vmem>>, vector<1x1xf32>
    %cst_30 = arith.constant dense<0.000000e+00> : vector<1xf32>
    %73 = vector.multi_reduction <add>, %46, %cst_30 [1] : vector<1x384xf32> to vector<1xf32>
    %74 = vector.shape_cast %73 : vector<1xf32> to vector<1x1xf32>
    %75 = arith.addf %72, %74 : vector<1x1xf32>
    %c0_31 = arith.constant 0 : index
    %c0_32 = arith.constant 0 : index
    %76 = vector.load %arg10[%c0_31, %c0_32] : memref<1x1xf32, #tpu.memory_space<vmem>>, vector<1x1xf32>
    tpu.vector_store %arg10[%c0_31, %c0_32], %75 {strides = array<i32>} : memref<1x1xf32, #tpu.memory_space<vmem>>, vector<1x1xf32>,
    %c0_33 = arith.constant 0 : index
    %c0_34 = arith.constant 0 : index
    %77 = vector.load %arg11[%c0_33, %c0_34] : memref<1x1xf32, #tpu.memory_space<vmem>>, vector<1x1xf32>
    %cst_35 = arith.constant dense<0.000000e+00> : vector<1xf32>
    %78 = vector.multi_reduction <add>, %51, %cst_35 [1] : vector<1x384xf32> to vector<1xf32>
    %79 = vector.shape_cast %78 : vector<1xf32> to vector<1x1xf32>
    %80 = arith.addf %77, %79 : vector<1x1xf32>
    %c0_36 = arith.constant 0 : index
    %c0_37 = arith.constant 0 : index
    %81 = vector.load %arg11[%c0_36, %c0_37] : memref<1x1xf32, #tpu.memory_space<vmem>>, vector<1x1xf32>
    tpu.vector_store %arg11[%c0_36, %c0_37], %80 {strides = array<i32>} : memref<1x1xf32, #tpu.memory_space<vmem>>, vector<1x1xf32>,
    %c0_38 = arith.constant 0 : index
    %c0_39 = arith.constant 0 : index
    %c0_40 = arith.constant 0 : index
    %82 = vector.load %arg5[%c0_38, %c0_39, %c0_40] : memref<1x8x384xf32, #tpu.memory_space<vmem>>, vector<1x8x384xf32>
    %83 = vector.shape_cast %82 : vector<1x8x384xf32> to vector<8x384xf32>
    %cst_41 = arith.constant dense<0xFF800000> : vector<384xf32>
    %84 = vector.multi_reduction <maximumf>, %83, %cst_41 [0] : vector<8x384xf32> to vector<384xf32>
    %85 = vector.shape_cast %84 : vector<384xf32> to vector<1x384xf32>
    %86 = vector.broadcast %85 : vector<1x384xf32> to vector<8x384xf32>
    %87 = arith.subf %83, %86 : vector<8x384xf32>
    %88 = math.exp %87 : vector<8x384xf32>
    %cst_42 = arith.constant dense<0.000000e+00> : vector<384xf32>
    %89 = vector.multi_reduction <add>, %88, %cst_42 [0] : vector<8x384xf32> to vector<384xf32>
    %90 = vector.shape_cast %89 : vector<384xf32> to vector<1x384xf32>
    %91 = math.log %90 : vector<1x384xf32>
    %92 = arith.mulf %87, %24 : vector<8x384xf32>
    %cst_43 = arith.constant dense<0.000000e+00> : vector<384xf32>
    %93 = vector.multi_reduction <add>, %92, %cst_43 [0] : vector<8x384xf32> to vector<384xf32>
    %94 = vector.shape_cast %93 : vector<384xf32> to vector<1x384xf32>
    %cst_44 = arith.constant dense<0.000000e+00> : vector<384xf32>
    %95 = vector.multi_reduction <add>, %87, %cst_44 [0] : vector<8x384xf32> to vector<384xf32>
    %96 = vector.shape_cast %95 : vector<384xf32> to vector<1x384xf32>
    %97 = arith.subf %91, %94 : vector<1x384xf32>
    %cst_45 = arith.constant 0.000000e+00 : f32
    %98 = vector.broadcast %cst_45 : f32 to vector<1x384xf32>
    %99 = arith.select %15, %97, %98 : vector<1x384xi1>, vector<1x384xf32>
    %cst_46 = arith.constant 8.000000e+00 : f32
    %100 = vector.broadcast %cst_46 : f32 to vector<1x384xf32>
    %101 = arith.mulf %100, %91 : vector<1x384xf32>
    %102 = arith.subf %101, %96 : vector<1x384xf32>
    %cst_47 = arith.constant 0.000000e+00 : f32
    %103 = vector.broadcast %cst_47 : f32 to vector<1x384xf32>
    %104 = arith.select %15, %102, %103 : vector<1x384xi1>, vector<1x384xf32>
    %c0_48 = arith.constant 0 : index
    %c0_49 = arith.constant 0 : index
    %105 = vector.load %arg12[%c0_48, %c0_49] : memref<1x1xf32, #tpu.memory_space<vmem>>, vector<1x1xf32>
    %cst_50 = arith.constant dense<0.000000e+00> : vector<1xf32>
    %106 = vector.multi_reduction <add>, %99, %cst_50 [1] : vector<1x384xf32> to vector<1xf32>
    %107 = vector.shape_cast %106 : vector<1xf32> to vector<1x1xf32>
    %108 = arith.addf %105, %107 : vector<1x1xf32>
    %c0_51 = arith.constant 0 : index
    %c0_52 = arith.constant 0 : index
    %109 = vector.load %arg12[%c0_51, %c0_52] : memref<1x1xf32, #tpu.memory_space<vmem>>, vector<1x1xf32>
    tpu.vector_store %arg12[%c0_51, %c0_52], %108 {strides = array<i32>} : memref<1x1xf32, #tpu.memory_space<vmem>>, vector<1x1xf32>,
    %c0_53 = arith.constant 0 : index
    %c0_54 = arith.constant 0 : index
    %110 = vector.load %arg13[%c0_53, %c0_54] : memref<1x1xf32, #tpu.memory_space<vmem>>, vector<1x1xf32>
    %cst_55 = arith.constant dense<0.000000e+00> : vector<1xf32>
    %111 = vector.multi_reduction <add>, %104, %cst_55 [1] : vector<1x384xf32> to vector<1xf32>
    %112 = vector.shape_cast %111 : vector<1xf32> to vector<1x1xf32>
    %113 = arith.addf %110, %112 : vector<1x1xf32>
    %c0_56 = arith.constant 0 : index
    %c0_57 = arith.constant 0 : index
    %114 = vector.load %arg13[%c0_56, %c0_57] : memref<1x1xf32, #tpu.memory_space<vmem>>, vector<1x1xf32>
    tpu.vector_store %arg13[%c0_56, %c0_57], %113 {strides = array<i32>} : memref<1x1xf32, #tpu.memory_space<vmem>>, vector<1x1xf32>,
    %c0_i32_58 = arith.constant 0 : i32
    %115 = arith.cmpi eq, %arg2, %c0_i32_58 : i32
    %116 = arith.extui %115 : i1 to i32
    %c0_i32_59 = arith.constant 0 : i32
    %117 = arith.cmpi ne, %116, %c0_i32_59 : i32
    scf.if %117 {
      %cst_60 = arith.constant 0.000000e+00 : f32
      %118 = vector.broadcast %cst_60 : f32 to vector<32x128xf32>
      %c0_61 = arith.constant 0 : index
      %c0_62 = arith.constant 0 : index
      %c0_63 = arith.constant 0 : index
      %c0_64 = arith.constant 0 : index
      %119 = vector.load %arg6[%c0_61, %c0_62, %c0_63, %c0_64] : memref<1x1x32x128xf32, #tpu.memory_space<vmem>>, vector<1x1x32x128xf32>
      %120 = vector.shape_cast %119 : vector<1x1x32x128xf32> to vector<32x128xf32>
      %121 = vector.shape_cast %118 : vector<32x128xf32> to vector<1x1x32x128xf32>
      tpu.vector_store %arg6[%c0_61, %c0_62, %c0_63, %c0_64], %121 {strides = array<i32>} : memref<1x1x32x128xf32, #tpu.memory_space<vmem>>, vector<1x1x32x128xf32>,
      %c0_65 = arith.constant 0 : index
      %c0_66 = arith.constant 0 : index
      %122 = vector.load %arg7[%c0_65, %c0_66] : memref<8x1xf32, #tpu.memory_space<vmem>>, vector<8x1xf32>
      %c0_67 = arith.constant 0 : index
      %c0_68 = arith.constant 0 : index
      %c0_69 = arith.constant 0 : index
      %c0_70 = arith.constant 0 : index
      %123 = vector.load %arg6[%c0_67, %c0_68, %c0_69, %c0_70] : memref<1x1x32x128xf32, #tpu.memory_space<vmem>>, vector<1x1x8x1xf32>
      %124 = vector.shape_cast %123 : vector<1x1x8x1xf32> to vector<8x1xf32>
      %125 = vector.shape_cast %122 : vector<8x1xf32> to vector<1x1x8x1xf32>
      tpu.vector_store %arg6[%c0_67, %c0_68, %c0_69, %c0_70], %125 {strides = array<i32>} : memref<1x1x32x128xf32, #tpu.memory_space<vmem>>, vector<1x1x8x1xf32>,
      %c0_71 = arith.constant 0 : index
      %c0_72 = arith.constant 0 : index
      %126 = vector.load %arg8[%c0_71, %c0_72] : memref<8x1xf32, #tpu.memory_space<vmem>>, vector<8x1xf32>
      %c0_73 = arith.constant 0 : index
      %c0_74 = arith.constant 0 : index
      %c8 = arith.constant 8 : index
      %c0_75 = arith.constant 0 : index
      %127 = vector.load %arg6[%c0_73, %c0_74, %c8, %c0_75] : memref<1x1x32x128xf32, #tpu.memory_space<vmem>>, vector<1x1x8x1xf32>
      %128 = vector.shape_cast %127 : vector<1x1x8x1xf32> to vector<8x1xf32>
      %129 = vector.shape_cast %126 : vector<8x1xf32> to vector<1x1x8x1xf32>
      tpu.vector_store %arg6[%c0_73, %c0_74, %c8, %c0_75], %129 {strides = array<i32>} : memref<1x1x32x128xf32, #tpu.memory_space<vmem>>, vector<1x1x8x1xf32>,
      %c0_76 = arith.constant 0 : index
      %c0_77 = arith.constant 0 : index
      %130 = vector.load %arg9[%c0_76, %c0_77] : memref<8x1xf32, #tpu.memory_space<vmem>>, vector<8x1xf32>
      %c0_78 = arith.constant 0 : index
      %c0_79 = arith.constant 0 : index
      %c16 = arith.constant 16 : index
      %c0_80 = arith.constant 0 : index
      %131 = vector.load %arg6[%c0_78, %c0_79, %c16, %c0_80] : memref<1x1x32x128xf32, #tpu.memory_space<vmem>>, vector<1x1x8x1xf32>
      %132 = vector.shape_cast %131 : vector<1x1x8x1xf32> to vector<8x1xf32>
      %133 = vector.shape_cast %130 : vector<8x1xf32> to vector<1x1x8x1xf32>
      tpu.vector_store %arg6[%c0_78, %c0_79, %c16, %c0_80], %133 {strides = array<i32>} : memref<1x1x32x128xf32, #tpu.memory_space<vmem>>, vector<1x1x8x1xf32>,
      %c0_81 = arith.constant 0 : index
      %c0_82 = arith.constant 0 : index
      %134 = vector.load %arg10[%c0_81, %c0_82] : memref<1x1xf32, #tpu.memory_space<vmem>>, vector<1x1xf32>
      %c0_83 = arith.constant 0 : index
      %c0_84 = arith.constant 0 : index
      %c24 = arith.constant 24 : index
      %c0_85 = arith.constant 0 : index
      %135 = vector.load %arg6[%c0_83, %c0_84, %c24, %c0_85] : memref<1x1x32x128xf32, #tpu.memory_space<vmem>>, vector<1x1x1x1xf32>
      %136 = vector.shape_cast %135 : vector<1x1x1x1xf32> to vector<1x1xf32>
      %137 = vector.shape_cast %134 : vector<1x1xf32> to vector<1x1x1x1xf32>
      tpu.vector_store %arg6[%c0_83, %c0_84, %c24, %c0_85], %137 {strides = array<i32>} : memref<1x1x32x128xf32, #tpu.memory_space<vmem>>, vector<1x1x1x1xf32>,
      %c0_86 = arith.constant 0 : index
      %c0_87 = arith.constant 0 : index
      %138 = vector.load %arg11[%c0_86, %c0_87] : memref<1x1xf32, #tpu.memory_space<vmem>>, vector<1x1xf32>
      %c0_88 = arith.constant 0 : index
      %c0_89 = arith.constant 0 : index
      %c25 = arith.constant 25 : index
      %c0_90 = arith.constant 0 : index
      %139 = vector.load %arg6[%c0_88, %c0_89, %c25, %c0_90] : memref<1x1x32x128xf32, #tpu.memory_space<vmem>>, vector<1x1x1x1xf32>
      %140 = vector.shape_cast %139 : vector<1x1x1x1xf32> to vector<1x1xf32>
      %141 = vector.shape_cast %138 : vector<1x1xf32> to vector<1x1x1x1xf32>
      tpu.vector_store %arg6[%c0_88, %c0_89, %c25, %c0_90], %141 {strides = array<i32>} : memref<1x1x32x128xf32, #tpu.memory_space<vmem>>, vector<1x1x1x1xf32>,
      %c0_91 = arith.constant 0 : index
      %c0_92 = arith.constant 0 : index
      %142 = vector.load %arg12[%c0_91, %c0_92] : memref<1x1xf32, #tpu.memory_space<vmem>>, vector<1x1xf32>
      %c0_93 = arith.constant 0 : index
      %c0_94 = arith.constant 0 : index
      %c26 = arith.constant 26 : index
      %c0_95 = arith.constant 0 : index
      %143 = vector.load %arg6[%c0_93, %c0_94, %c26, %c0_95] : memref<1x1x32x128xf32, #tpu.memory_space<vmem>>, vector<1x1x1x1xf32>
      %144 = vector.shape_cast %143 : vector<1x1x1x1xf32> to vector<1x1xf32>
      %145 = vector.shape_cast %142 : vector<1x1xf32> to vector<1x1x1x1xf32>
      tpu.vector_store %arg6[%c0_93, %c0_94, %c26, %c0_95], %145 {strides = array<i32>} : memref<1x1x32x128xf32, #tpu.memory_space<vmem>>, vector<1x1x1x1xf32>,
      %c0_96 = arith.constant 0 : index
      %c0_97 = arith.constant 0 : index
      %146 = vector.load %arg13[%c0_96, %c0_97] : memref<1x1xf32, #tpu.memory_space<vmem>>, vector<1x1xf32>
      %c0_98 = arith.constant 0 : index
      %c0_99 = arith.constant 0 : index
      %c27 = arith.constant 27 : index
      %c0_100 = arith.constant 0 : index
      %147 = vector.load %arg6[%c0_98, %c0_99, %c27, %c0_100] : memref<1x1x32x128xf32, #tpu.memory_space<vmem>>, vector<1x1x1x1xf32>
      %148 = vector.shape_cast %147 : vector<1x1x1x1xf32> to vector<1x1xf32>
      %149 = vector.shape_cast %146 : vector<1x1xf32> to vector<1x1x1x1xf32>
      tpu.vector_store %arg6[%c0_98, %c0_99, %c27, %c0_100], %149 {strides = array<i32>} : memref<1x1x32x128xf32, #tpu.memory_space<vmem>>, vector<1x1x1x1xf32>,
    } else {
    }
    return
  }
  func.func @transform_0(%arg0: i32, %arg1: i32, %arg2: i32) -> (i32, i32, i32) {
    %c1_i32 = arith.constant 1 : i32
    %0 = arith.muli %arg1, %c1_i32 : i32
    %1 = arith.addi %0, %arg2 : i32
    %c0_i32 = arith.constant 0 : i32
    %2 = arith.minsi %1, %c0_i32 : i32
    %c0_i32_0 = arith.constant 0 : i32
    %c0_i32_1 = arith.constant 0 : i32
    return %arg0, %c0_i32_0, %2 : i32, i32, i32
  }
  func.func @transform_1(%arg0: i32, %arg1: i32, %arg2: i32) -> (i32, i32, i32) {
    %c1_i32 = arith.constant 1 : i32
    %0 = arith.muli %arg1, %c1_i32 : i32
    %1 = arith.addi %0, %arg2 : i32
    %c0_i32 = arith.constant 0 : i32
    %2 = arith.minsi %1, %c0_i32 : i32
    %c0_i32_0 = arith.constant 0 : i32
    %c0_i32_1 = arith.constant 0 : i32
    return %arg0, %c0_i32_0, %2 : i32, i32, i32
  }
  func.func @transform_2(%arg0: i32, %arg1: i32, %arg2: i32) -> (i32, i32, i32) {
    %c1_i32 = arith.constant 1 : i32
    %0 = arith.muli %arg1, %c1_i32 : i32
    %1 = arith.addi %0, %arg2 : i32
    %c0_i32 = arith.constant 0 : i32
    %2 = arith.minsi %1, %c0_i32 : i32
    %c0_i32_0 = arith.constant 0 : i32
    %c0_i32_1 = arith.constant 0 : i32
    return %arg0, %c0_i32_0, %2 : i32, i32, i32
  }
  func.func @transform_3(%arg0: i32, %arg1: i32, %arg2: i32) -> (i32, i32, i32, i32) {
    %c0_i32 = arith.constant 0 : i32
    %c0_i32_0 = arith.constant 0 : i32
    %c0_i32_1 = arith.constant 0 : i32
    return %arg0, %arg1, %c0_i32, %c0_i32_0 : i32, i32, i32, i32
  }
}

</mosaic_0001>

<bundles_post_ra>
// kernel: tpu_custom_call.1
= control target key start
LH: loop header
LB: loop body
LE: loop exit
PB: predicated region body
PF: predicated region fallthrough
CT: control target
= control target key end

     0   :  { %s1954_s0 = inlined_call_operand.hbm [shape: s32[2,1,288], index: 0, kind: input, shape index: {}]   ;;  %s1955_s1 = inlined_call_operand.hbm [shape: f32[2,8,288], index: 1, kind: input, shape index: {}]   ;;  %s1956_s2 = inlined_call_operand.hbm [shape: f32[2,8,288], index: 2, kind: input, shape index: {}]   ;;  %s1957_s3 = inlined_call_operand.hbm [shape: f32[2,1,32,128], index: 3, kind: output, shape index: {}]  }
   0x1   :  { %1962 = sst [smem:[#allocation22_spill]] %s1955_s1 }
   0x2   :  { %8 = vsyncpa [#allocation10], 0 }
   0x3   :  { %10 = vsyncpa [#allocation10 + $0x1], 0 }
   0x4   :  { %11 = vsyncpa [#allocation13], 0 }
   0x5   :  { %13 = vsyncpa [#allocation13 + $0x1], 0 }
   0x6   :  { %14 = vsyncpa [#allocation11], 0 }
   0x7   :  { %16 = vsyncpa [#allocation11 + $0x1], 0  ;;  %s1423_s12 = smov 0   ;;  %s1425_s13 = smov 0  }
   0x8   :  { %s1427_s14 = smov 0   ;;  %s1429_s15 = smov 0  }
   0x9   :  { %s1431_s16 = smov 0   ;;  %s1433_s17 = smov 0  }
   0xa LB: > { %1963 = sst [smem:[#allocation19_spill]] %s1379_s14  ;;  %s1454_s18 = sadd.s32 4294967295, %s1391_s17   ;;  %s1391_s17 = sphi %s1433_s17, %s22_s17   ;;  %s1387_s16 = sphi %s1431_s16, %s1987_s16   ;;  %s1383_s15 = sphi %s1429_s15, %s1986_s15   ;;  %s1379_s14 = sphi %s1427_s14, %s1982_s14   ;;  %s1375_s13 = sphi %s1425_s13, %s1985_s13   ;;  %s1371_s12 = sphi %s1423_s12, %s1984_s12  }
   0xb   : > { %s1081_s19 = sadd.s32 4294967294, %s1391_s17   ;;  %s41_s20 = sadd.s32 1, %s1387_s16 }
   0xc   : > { %s56_s21 = sadd.s32 1, %s1379_s14  ;;  %p43_p0 = scmp.ge.s32.totalorder %s41_s20, 2 }
   0xd   : > { %p63_p1 = scmp.ne.s32.totalorder %s1379_s14, %s1375_s13  ;;  %p64_p2 = scmp.eq.s32.totalorder %s1391_s17, 0 }
   0xe   : > { %p69_p3 = scmp.ne.s32.totalorder %s1375_s13, %s1371_s12  ;;  %s1989_s20 = smov (%p43_p0, %s41_s20), 0 }
   0xf   : > { %1964 = sst [smem:[#allocation20_spill]] %s1989_s20  ;;  %p1466_p4 = por %p64_p2, %p63_p1 }
  0x10   : > { %p70_p5 = scmp.eq.s32.totalorder %s1454_s18, 0  ;;  %s51_s23 = ssub.s32 %s1387_s16, %s1989_s20 }
  0x11   : > { %p163_p6 = scmp.eq.s32.totalorder %s1454_s18, 1  ;;  %p54_p7 = scmp.eq.s32.totalorder %s51_s23, 0 }
  0x12   : > { %p1474_p8 = por %p70_p5, %p69_p3  ;;  %p169_p10 = scmp.eq.s32.totalorder %s1081_s19, 1 }
  0x13   : > { %p1478_p9 = por %p163_p6, %p63_p1  ;;  %p1129_p13 = scmp.lt.s32.totalorder %s1391_s17, 2 }
  0x14   : > { %s1966_s24 = scalar_select %p1474_p8, 1, 0 }
  0x15   : > { %s1967_s25 = scalar_select %p1478_p9, 1, 0 }
  0x16   : > { %s1483_s26 = scalar_select %p54_p7, %s1379_s14, %s56_s21  }
  0x17   : > { %p1485_p11 = por %p169_p10, %p69_p3  ;;  %s1492_s28 = sand.u32 1, %s1379_s14  }
  0x18   : > { %1968 = sst [smem:[#allocation21_spill]] %s1483_s26  ;;  %s213_s29 = sand.u32 1, %s1391_s17  }
  0x19   : > { %s1969_s27 = scalar_select %p1485_p11, 1, 0 }
  0x1a   : > { %s1101_s30 = smul.u32 24, %s1492_s28  ;;  %p1498_p0 = pnand %p1129_p13, %p1466_p4 }
  0x1b   : > { %s1102_s5 = smul.u32 384, %s1387_s16  ;;  %s1971_s1 = sld [smem:[#allocation22_spill]] }
  0x1c   : > { %s217_s6 = scalar_lea.vmem [#allocation12], %s1101_s30  ;;  %s1514_s11 = scalar_lea.sflag [#allocation13], %s213_s29 }
  0x1d   : > { %s230_s7 = sshll.u32 %s217_s6, 4  ;;  %p1520_p2 = pneg %p1498_p0  ;;  %s1512_s7 = int_to_ptr.vmem [resolvable:$true] %s230_s7 }
  0x21   : > { %s1510_s10 = scalar_lea.hbm %s1971_s1, %s1102_s5  ;;  %s1220_s6 = scalar_lea.hbm %s1971_s1, 768 }
  0x22   : > { %s1215_s19 = scalar_lea.hbm %s1510_s10, 384  ;;  %p1221_p5 = scmp.lt.u32.totalorder %s1510_s10, %s1971_s1 }
  0x23   : > { %p1216_p1 = scmp.ne.s32.totalorder %s1510_s10, %s1215_s19  ;;  %p1222_p6 = scmp.lt.u32.totalorder %s1220_s6, %s1215_s19 }
  0x24   : > { %p1224_p10 = scmp.lt.u32.totalorder %s1215_s19, %s1510_s10 }
  0x25   : > { %p1218_p3 = pnand %p1520_p2, %p1216_p1  ;;  %p1223_p7 = por %p1222_p6, %p1221_p5 }
  0x27   : > { %p1219_p4 = pneg %p1218_p3  ;;  %p1225_p13 = por %p1224_p10, %p1223_p7 }
  0x29   : > { %p1226_p12 = pnand %p1225_p13, %p1219_p4 }
  0x2b   : > { %1229 = shalt.err (!%p1226_p12)
}
  0x2c   : > { %s1230_s29 = scalar_lea.vmem %s1512_s7, 384  ;;  %s1393_s22 = smov [#allocation12]  }
  0x2d   : > { %p1231_p1 = scmp.ne.s32.totalorder %s1512_s7, %s1230_s29  ;;  %s1235_s23 = sshll.u32 %s1393_s22, 4  ;;  %s1236_s23 = int_to_ptr.vmem [resolvable:$false] %s1235_s23 }
  0x2e   : > { %s1237_s8 = scalar_lea.vmem %s1236_s23, 768  ;;  %p1238_p9 = scmp.lt.s32.totalorder %s1512_s7, %s1236_s23 }
  0x2f   : > { %p1233_p3 = pnand %p1231_p1, %p1520_p2  ;;  %p1239_p8 = scmp.lt.s32.totalorder %s1237_s8, %s1230_s29 }
  0x31   : > { %p1234_p11 = pneg %p1233_p3  ;;  %p1240_p5 = por %p1239_p8, %p1238_p9 }
  0x33   : > { %p1241_p6 = pnand %p1240_p5, %p1234_p11 }
  0x35   : > { %1244 = shalt.err (!%p1241_p6)
}
  0x36   : > { %1121 = dma.hbm_to_vmem [thread:$0]  (!%p1498_p0), %s1510_s10, 384, %s1512_s7, %s1514_s11  }
  0x37   : > { %p1087_p12 = scmp.ge.s32.totalorder %s1391_s17, 1  ;;  %p259_p4 = scmp.lt.s32.totalorder %s1391_s17, 3 }
  0x38   : > { %s1099_s6 = smul.u32 3, %s1492_s28  ;;  %s1557_s23 = scalar_lea.hbm %s1956_s2, %s1102_s5 }
  0x39   : > { %p1546_p7 = pnand %p1087_p12, %p259_p4  ;;  %s1100_s9 = smul.u32 48, %s1387_s16 }
  0x3a   : > { %s241_s8 = scalar_lea.vmem [#allocation14], %s1101_s30  ;;  %s193_s26 = scalar_lea.vmem [#allocation9], %s1099_s6 }
  0x3b   : > { %s1973_s19 = scalar_select %p1546_p7, 1, 0 }
  0x3c   : > { %s254_s1 = sshll.u32 %s241_s8, 4  ;;  %s1564_s10 = scalar_lea.hbm %s1954_s0, %s1100_s9  ;;  %s1568_s1 = int_to_ptr.vmem [resolvable:$true] %s254_s1 }
  0x3d   : > { %s206_s14 = sshll.u32 %s193_s26, 4  ;;  %s190_s5 = scalar_lea.sflag [#allocation10], %s1492_s28  ;;  %s1566_s14 = int_to_ptr.vmem [resolvable:$true] %s206_s14 }
  0x3e   : > { %s1245_s29 = scalar_lea.hbm %s1564_s10, 48  ;;  %s1250_s9 = scalar_lea.hbm %s1954_s0, 96 }
  0x3f   : > { %p1246_p8 = scmp.ne.s32.totalorder %s1564_s10, %s1245_s29  ;;  %p1251_p10 = scmp.lt.u32.totalorder %s1564_s10, %s1954_s0 }
  0x40   : > { %p1252_p13 = scmp.lt.u32.totalorder %s1250_s9, %s1245_s29  ;;  %p1254_p3 = scmp.lt.u32.totalorder %s1245_s29, %s1564_s10 }
  0x41   : > { %p1248_p9 = pnand %p1246_p8, %p1520_p2 }
  0x42   : > { %p1253_p1 = por %p1252_p13, %p1251_p10 }
  0x43   : > { %p1249_p11 = pneg %p1248_p9 }
  0x44   : > { %p1255_p5 = por %p1254_p3, %p1253_p1 }
  0x46   : > { %p1256_p6 = pnand %p1255_p5, %p1249_p11 }
  0x48   : > { %1259 = shalt.err (!%p1256_p6)
}
  0x49   : > { %s1260_s26 = scalar_lea.vmem %s1566_s14, 48  ;;  %s1394_s28 = smov [#allocation9]  }
  0x4a   : > { %p1261_p12 = scmp.ne.s32.totalorder %s1566_s14, %s1260_s26  ;;  %s1265_s6 = sshll.u32 %s1394_s28, 4  ;;  %s1266_s6 = int_to_ptr.vmem [resolvable:$false] %s1265_s6 }
  0x4b   : > { %s1267_s7 = scalar_lea.vmem %s1266_s6, 96  ;;  %p1268_p9 = scmp.lt.s32.totalorder %s1566_s14, %s1266_s6 }
  0x4c   : > { %p1263_p4 = pnand %p1261_p12, %p1520_p2  ;;  %p1269_p7 = scmp.lt.s32.totalorder %s1267_s7, %s1260_s26 }
  0x4e   : > { %p1264_p8 = pneg %p1263_p4  ;;  %p1270_p10 = por %p1269_p7, %p1268_p9 }
  0x50   : > { %p1271_p13 = pnand %p1270_p10, %p1264_p8 }
  0x52   : > { %1274 = shalt.err (!%p1271_p13)
}
  0x53   : > { %1118 = dma.hbm_to_vmem [thread:$0]  (!%p1498_p0), %s1564_s10, 48, %s1566_s14, %s190_s5  }
  0x54   : > { %s1275_s29 = scalar_lea.hbm %s1557_s23, 384  ;;  %s1280_s9 = scalar_lea.hbm %s1956_s2, 768 }
  0x55   : > { %p1276_p11 = scmp.ne.s32.totalorder %s1557_s23, %s1275_s29  ;;  %p1281_p7 = scmp.lt.u32.totalorder %s1557_s23, %s1956_s2 }
  0x56   : > { %p1282_p5 = scmp.lt.u32.totalorder %s1280_s9, %s1275_s29  ;;  %p1284_p12 = scmp.lt.u32.totalorder %s1275_s29, %s1557_s23 }
  0x57   : > { %p1278_p1 = pnand %p1276_p11, %p1520_p2 }
  0x58   : > { %p1283_p6 = por %p1282_p5, %p1281_p7 }
  0x59   : > { %p1279_p3 = pneg %p1278_p1 }
  0x5a   : > { %p1285_p4 = por %p1284_p12, %p1283_p6 }
  0x5c   : > { %p1286_p8 = pnand %p1285_p4, %p1279_p3 }
  0x5e   : > { %1289 = shalt.err (!%p1286_p8)
}
  0x5f   : > { %s1290_s14 = scalar_lea.vmem %s1568_s1, 384  ;;  %s1395_s10 = smov [#allocation14]  }
  0x60   : > { %p1291_p9 = scmp.ne.s32.totalorder %s1568_s1, %s1290_s14  ;;  %s1295_s5 = sshll.u32 %s1395_s10, 4  ;;  %s1296_s5 = int_to_ptr.vmem [resolvable:$false] %s1295_s5 }
  0x61   : > { %s1297_s26 = scalar_lea.vmem %s1296_s5, 768  ;;  %p1298_p11 = scmp.lt.s32.totalorder %s1568_s1, %s1296_s5 }
  0x62   : > { %p1293_p10 = pnand %p1291_p9, %p1520_p2  ;;  %p1299_p1 = scmp.lt.s32.totalorder %s1297_s26, %s1290_s14 }
  0x64   : > { %p1294_p13 = pneg %p1293_p10  ;;  %p1300_p7 = por %p1299_p1, %p1298_p11 }
  0x66   : > { %p1301_p5 = pnand %p1300_p7, %p1294_p13 }
  0x68   : > { %1304 = shalt.err (!%p1301_p5)
}
  0x69   : > { %1124 = dma.hbm_to_vmem [thread:$0]  (!%p1498_p0), %s1557_s23, 384, %s1568_s1, %s1514_s11  }
  0x6a   : > { %p1974_p3 = scmp.ne.s32.totalorder %s1973_s19, 0 }
  0x6b   : > { %s1617_s21 = sand.u32 (!%p1974_p3), 1, %s1375_s13   ;;  %p1975_p2 = scmp.ne.s32.totalorder (!%p1974_p3), %s1966_s24, 0 }
  0x6c   : > { %263 = sbr.rel (%p1974_p3) target bundleno = 378 (0x17a), region = 32  ;;  %s266_s6 = scalar_lea.sflag (!%p1974_p3), [#allocation10], %s1617_s21 }
  0x6d   : > { %s1105_s28 = smul.u32 (!%p1974_p3), 3, %s1617_s21 }
  0x6f   : > { %s1621_s7 = scalar_lea.vmem (!%p1974_p3), [#allocation9], %s1105_s28 }
  0x73   : > { %1358 = dma.done.wait (%p1975_p2), %s266_s6, 48  }
  0x74   : > { %1360 = vsyncadd (%p1975_p2), %s266_s6, 4294967248  ;;  %s274_s1 = sand.u32 1, %s1454_s18   ;;  %s1106_s4 = smul.u32 24, %s1617_s21 }
  0x75   : > { %s275_s11 = scalar_lea.sflag [#allocation13], %s274_s1 }
  0x76   : > { %s1631_s19 = scalar_lea.vmem [#allocation12], %s1106_s4 }
  0x77   : > { %1362 = dma.done.wait (%p1975_p2), %s275_s11, 768  }
  0x78   : > { %1364 = vsyncadd (%p1975_p2), %s275_s11, 4294966528  ;;  %v348_v0 = vlaneseq  ;;  %s1088_s23 = sshll.u32 %s1617_s21, 5  ;;  %vm336_vm0 = vcmask 7168   ;;  %v1396_v2 = vmov 1966171168   ;;  %v1397_v5 = vmov 0.0  }
  0x79   : > { %v365_v3 = vunpack.c.l.s4 %v1396_v2  ;;  %s1640_s18 = scalar_lea.vmem [#allocation15], %s1088_s23  ;;  %338 = vst.msk [vmem:[#allocation3] sm:$0xff] %vm336_vm0, %v1397_v5  ;;  %337 = vst.msk [vmem:[#allocation2] sm:$0xff] %vm336_vm0, %v1397_v5  ;;  %v1398_v7 = vmov 1   ;;  %v346_v11 = vld [vmem:[%s1621_s7] sm:$0x7] }
  0x7a   : > { %v349_v1 = vand.u32 127, %v348_v0  ;;  %v1638_v4 = vshrl.u32 %v348_v0, 7  ;;  %908 = vst [vmem:[%s1640_s18 + $0x8] sm:$0xff] %v1397_v5  ;;  %339 = vst.msk [vmem:[#allocation4] sm:$0xff] %vm336_vm0, %v1397_v5  ;;  %v363_v8 = vcombine.low %v1398_v7, %v1398_v7  ;;  %v1399_v12 = vmov 0   ;;  %v414_v14 = vld [vmem:[%s1631_s19] sm:$0xff] }
  0x7b   : > { %907 = vst [vmem:[%s1640_s18] sm:$0xff] %v1397_v5  ;;  %909 = vst [vmem:[%s1640_s18 + $0x10] sm:$0xff] %v1397_v5  ;;  %v366_v9 = vunpack.c.0.s8 %v365_v3  ;;  %v415_v15 = vld [vmem:[%s1631_s19 + $0x8] sm:$0xff]  ;;  %v416_v18 = vld [vmem:[%s1631_s19 + $0x10] sm:$0xff]  ;;  %v423_v19 = vrot.slane %v414_v14, 4  ;;  %s287_s24 = scalar_lea.vmem [#allocation14], %s1106_s4  ;;  %vm359_vm2 = vcmp.ne.s32.totalorder %v346_v11, 255 }
  0x7c   : > { %910 = vst [vmem:[%s1640_s18 + $0x18] sm:$0xff] %v1397_v5  ;;  %v351_v6 = vadd.s32 256, %v349_v1  ;;  %v1667_v20 = vld [vmem:[%s287_s24] sm:$0xff]  ;;  %v1669_v21 = vld [vmem:[%s287_s24 + $0x8] sm:$0xff]  ;;  %v429_v23 = vrot.slane %v415_v15, 4  ;;  %v1671_v24 = vld [vmem:[%s287_s24 + $0x10] sm:$0xff] }
  0x7d   : > { %v1657_v10 = vsub.s32 %v366_v9, %v1638_v4  ;;  %v697_v25 = vrot.slane %v1667_v20, 4  ;;  %v703_v26 = vrot.slane %v1669_v21, 4  ;;  %v424_v28 = vmax.f32 %v414_v14, %v423_v19  ;;  %s1098_s29 = sshll.u32 %s1383_s15, 9  ;;  %s941_s30 = sshll.u32 %s1640_s18, 4  ;;  %s1903_s30 = int_to_ptr.vmem [resolvable:$true] %s941_s30 }
  0x7e   : > { %vm358_vm1 = vcmp.lt.s32.totalorder %v351_v6, 288  ;;  %v709_v30 = vrot.slane %v1671_v24, 4  ;;  %v1677_v31 = vsub.s32 0, %v1638_v4  ;;  %v430_v32 = vmax.f32 %v415_v15, %v429_v23  ;;  %s1901_s22 = scalar_lea.hbm %s1957_s3, %s1098_s29  ;;  %s926_s8 = scalar_lea.sflag [#allocation11], %s1617_s21 }
  0x7f   : > { %v362_v13 = vsel %vm358_vm1, 1, %v1399_v12  ;;  %v370_v16 = vrot.slane %v363_v8, %v1657_v10  ;;  %v422_v22 = vsel %vm358_vm1, %v416_v18, 0.0  ;;  %v698_v33 = vmax.f32 %v1667_v20, %v697_v25  ;;  %s1305_s14 = scalar_lea.vmem %s1903_s30, 512  ;;  %p1978_p6 = scmp.ne.s32.totalorder %s1967_s25, 0 }
  0x80   : > { %v377_v17 = vrot.slane %v362_v13, %v1657_v10  ;;  %v435_v29 = vrot.slane %v422_v22, 4  ;;  %v704_v34 = vmax.f32 %v1669_v21, %v703_v26  ;;  %v425_v36 = vrot.slane %v424_v28, 2  ;;  %p1306_p0 = scmp.ne.s32.totalorder %s1903_s30, %s1305_s14  ;;  %s1400_s15 = smov [#allocation15]  }
  0x81   : > { %v431_v38 = vrot.slane %v430_v32, 2  ;;  %v699_v39 = vrot.slane %v698_v33, 2  ;;  %v710_v41 = vmax.f32 %v1671_v24, %v709_v30  ;;  %v1684_v42 = vsub.s32 1, %v1638_v4  ;;  %s1309_s10 = sshll.u32 %s1400_s15, 4  ;;  %s1310_s10 = int_to_ptr.vmem [resolvable:$false] %s1309_s10 }
  0x82   : > { %v378_v27 = vcombine.low %v370_v16, %v377_v17  ;;  %v436_v37 = vmax.f32 %v422_v22, %v435_v29  ;;  %v705_v40 = vrot.slane %v704_v34, 2  ;;  %v426_v43 = vmax.f32 %v424_v28, %v425_v36  ;;  %p1307_p12 = pnand %p1306_p0, %p1978_p6  ;;  %s1311_s5 = scalar_lea.vmem %s1310_s10, 1024 }
  0x83   : > { %v1691_v46 = vsub.s32 2, %v1638_v4  ;;  %v432_v47 = vmax.f32 %v430_v32, %v431_v38  ;;  %v700_v48 = vmax.f32 %v698_v33, %v699_v39  ;;  %v711_v54 = vrot.slane %v710_v41, 2  ;;  %p1312_p8 = scmp.lt.s32.totalorder %s1903_s30, %s1310_s10  ;;  %p1313_p9 = scmp.lt.s32.totalorder %s1311_s5, %s1305_s14 }
  0x84   : > { %v385_v35 = vrot.slane %v378_v27, %v1657_v10  ;;  %v437_v44 = vrot.slane %v436_v37, 2  ;;  %v706_v49 = vmax.f32 %v704_v34, %v705_v40  ;;  %v427_v50 = vrot.slane %v426_v43, 1  ;;  %p1308_p4 = pneg %p1307_p12 }
  0x85   : > { %v433_v53 = vrot.slane %v432_v47, 1  ;;  %v701_v61 = vrot.slane %v700_v48, 1  ;;  %v712_v18 = vmax.f32 %v710_v41, %v711_v54  ;;  %vm657_vm8 = vcmask 1040384   ;;  %p1314_p10 = por %p1313_p9, %p1312_p8 }
  0x86   : > { %vm386_vm3 = vcmp.ne.s32.totalorder %v385_v35, 0  ;;  %v438_v51 = vmax.f32 %v436_v37, %v437_v44  ;;  %v428_v55 = vmax.f32 %v426_v43, %v427_v50  ;;  %v707_v62 = vrot.slane %v706_v49, 1 }
  0x87   : > { %vm1686_vm4 = vmand %vm359_vm2, %vm386_vm3  ;;  %v434_v59 = vmax.f32 %v432_v47, %v433_v53  ;;  %v702_v12 = vmax.f32 %v700_v48, %v701_v61  ;;  %v713_v27 = vrot.slane %v712_v18, 1  ;;  %vm340_vm9 = vcmask 0   ;;  %p1315_p13 = pnand %p1314_p10, %p1308_p4 }
  0x88   : > { %v390_v52 = vsel %vm1686_vm4, %v346_v11, 4294967295  ;;  %v439_v56 = vrot.slane %v438_v51, 1  ;;  %v1698_v0 = vsub.f32 %v414_v14, %v428_v55  ;;  %v708_v13 = vmax.f32 %v706_v49, %v707_v62  ;;  %341 = vst.msk [vmem:[#allocation5] sm:$0x1] %vm340_vm9, %v1397_v5  ;;  %342 = vst.msk [vmem:[#allocation6] sm:$0x1] %vm340_vm9, %v1397_v5 }
  0x89   : > { %v396_v57 = vrot.slane %v390_v52, %v1677_v31  ;;  %v400_v58 = vrot.slane %v390_v52, %v1684_v42  ;;  %v404_v60 = vrot.slane %v390_v52, %v1691_v46  ;;  %v1702_v1 = vsub.f32 %v415_v15, %v434_v59  ;;  %343 = vst.msk [vmem:[#allocation7] sm:$0x1] %vm340_vm9, %v1397_v5 }
  0x8a   : > { %v440_v63 = vmax.f32 %v438_v51, %v439_v56  ;;  %v444_v7 = vmul.f32 1.442695, %v1698_v0  ;;  %v1727_v19 = vsub.f32 %v1667_v20, %v702_v12  ;;  %v1730_v23 = vsub.f32 %v1669_v21, %v708_v13  ;;  %344 = vst.msk [vmem:[#allocation8] sm:$0x1] %vm340_vm9, %v1397_v5 }
  0x8b   : > { %vm405_vm5 = vcmp.eq.s32.totalorder %v1638_v4, %v396_v57  ;;  %vm406_vm6 = vcmp.eq.s32.totalorder %v1638_v4, %v400_v58  ;;  %vm407_vm7 = vcmp.eq.s32.totalorder %v1638_v4, %v404_v60  ;;  %v446_v11 = vmul.f32 1.442695, %v1702_v1 }
  0x8c   : > { %v1706_v2 = vsel %vm405_vm5, 1.0, %v1397_v5  ;;  %v1709_v3 = vsel %vm406_vm6, 1.0, %v1397_v5  ;;  %v1711_v6 = vsub.f32 %v422_v22, %v440_v63  ;;  %v1715_v8 = vsel %vm407_vm7, 1.0, %v1397_v5 }
  0x8d   : > { %v634_v9 = vadd.f32 %v1709_v3, %v1706_v2  ;;  %v475_v4 = vmul.f32 %v1709_v3, %v1702_v1  ;;  %1185 = vpow2.f32 %v444_v7  ;;  %v474_v25 = vmul.f32 %v1706_v2, %v1698_v0 }
  0x8e   : > { %v448_v14 = vmul.f32 1.442695, %v1711_v6  ;;  %v476_v15 = vmul.f32 %v1715_v8, %v1711_v6  ;;  %1187 = vpow2.f32 %v446_v11  ;;  %v718_v28 = vmul.f32 1.442695, %v1727_v19 }
  0x8f   : > { %v635_v16 = vadd.f32 %v1715_v8, %v634_v9  ;;  %v483_v17 = vrot.slane %v475_v4, 4  ;;  %v748_v29 = vmul.f32 %v1706_v2, %v1727_v19  ;;  %v720_v20 = vmul.f32 1.442695, %v1730_v23 }
  0x90   : > { %1189 = vpow2.f32 %v448_v14  ;;  %v489_v22 = vrot.slane %v476_v15, 4  ;;  %v749_v32 = vmul.f32 %v1709_v3, %v1730_v23  ;;  %v477_v33 = vrot.slane %v474_v25, 4 }
  0x91   : > { %636 = vadd.xlane.f32.xlu1 %v635_v16  ;;  %v484_v26 = vadd.f32 %v483_v17, %v475_v4  ;;  %v714_v34 = vmax.f32 %v712_v18, %v713_v27  ;;  %1191 = vpow2.f32 %v718_v28  ;;  %v751_v35 = vrot.slane %v748_v29, 4 }
  0x92   : > { %v490_v30 = vadd.f32 %v489_v22, %v476_v15  ;;  %v757_v37 = vrot.slane %v749_v32, 4  ;;  %v1743_v38 = vsel %vm1686_vm4, 1.0, %v1397_v5  ;;  %v478_v40 = vadd.f32 %v477_v33, %v474_v25 }
  0x93   : > { %v485_v21 = vrot.slane %v484_v26, 2  ;;  %v1746_v39 = vsub.f32 %v1671_v24, %v714_v34  ;;  %v752_v43 = vadd.f32 %v751_v35, %v748_v29  ;;  %1193 = vpow2.f32 %v720_v20 }
  0x94   : > { %v491_v36 = vrot.slane %v490_v30, 2  ;;  %v585_v49 = vrot.slane %v1743_v38, %v1677_v31  ;;  %v758_v51 = vadd.f32 %v757_v37, %v749_v32  ;;  %v479_v53 = vrot.slane %v478_v40, 2 }
  0x95   : > { %v486_v41 = vadd.f32 %v485_v21, %v484_v26  ;;  %v722_v44 = vmul.f32 1.442695, %v1746_v39  ;;  %v750_v47 = vmul.f32 %v1715_v8, %v1746_v39  ;;  %v495_v54 = vrot.slane %v1698_v0, 4 }
  0x96   : > { %v492_v50 = vadd.f32 %v491_v36, %v490_v30  ;;  %v753_v58 = vrot.slane %v752_v43, 2  ;;  %v589_v62 = vrot.slane %v1743_v38, %v1684_v42  ;;  %v501_v63 = vrot.slane %v1702_v1, 4 }
  0x97   : > { %v1751_v48 = vpop.eup %1185  ;;  %1195 = vpow2.f32 %v722_v44  ;;  %v487_v57 = vrot.slane %v486_v41, 1  ;;  %v763_v59 = vrot.slane %v750_v47, 4  ;;  %v593_v9 = vrot.slane %v1743_v38, %v1691_v46 }
  0x98   : > { %v1755_v52 = vpop.eup %1187  ;;  %v450_v24 = vrot.slane %v1751_v48, 4  ;;  %v493_v11 = vrot.slane %v492_v50, 1  ;;  %v759_v4 = vrot.slane %v758_v51, 2  ;;  %v1771_v15 = vadd.f32 %v479_v53, %v478_v40 }
  0x99   : > { %v456_v56 = vrot.slane %v1755_v52, 4  ;;  %v496_v16 = vadd.f32 %v495_v54, %v1698_v0  ;;  %v1774_v18 = vadd.f32 %v487_v57, %v486_v41  ;;  %v1776_v22 = vadd.f32 %v753_v58, %v752_v43 }
  0x9a   : > { %v1759_v55 = vpop.eup %1189  ;;  %v451_v60 = vadd.f32 %v1751_v48, %v450_v24  ;;  %v764_v25 = vadd.f32 %v763_v59, %v750_v47  ;;  %v502_v28 = vadd.f32 %v501_v63, %v1702_v1  ;;  %v507_v29 = vrot.slane %v1711_v6, 4 }
  0x9b   : > { %v462_v61 = vrot.slane %v1759_v55, 4  ;;  %v457_v7 = vadd.f32 %v1755_v52, %v456_v56  ;;  %v1192_v12 = vpop.eup %1191  ;;  %v1780_v20 = vadd.f32 %v493_v11, %v492_v50  ;;  %v760_v32 = vadd.f32 %v759_v4, %v758_v51 }
  0x9c   : > { %v452_v13 = vrot.slane %v451_v60, 2  ;;  %v724_v33 = vrot.slane %v1192_v12, 4  ;;  %v497_v35 = vrot.slane %v496_v16, 2  ;;  %v508_v36 = vadd.f32 %v507_v29, %v1711_v6 }
  0x9d   : > { %v463_v14 = vadd.f32 %v1759_v55, %v462_v61  ;;  %v458_v17 = vrot.slane %v457_v7, 2  ;;  %v1194_v21 = vpop.eup %1193  ;;  %v755_v40 = vrot.slane %v1776_v22, 1  ;;  %v481_v41 = vrot.slane %v1771_v15, 1 }
  0x9e   : > { %v453_v26 = vadd.f32 %v452_v13, %v451_v60  ;;  %v725_v43 = vadd.f32 %v1192_v12, %v724_v33  ;;  %v765_v24 = vrot.slane %v764_v25, 2  ;;  %v503_v50 = vrot.slane %v502_v28, 2 }
  0x9f   : > { %v464_v27 = vrot.slane %v463_v14, 2  ;;  %v459_v30 = vadd.f32 %v458_v17, %v457_v7  ;;  %v761_v51 = vrot.slane %v760_v32, 1  ;;  %v730_v56 = vrot.slane %v1194_v21, 4 }
  0xa0   : > { %v454_v34 = vrot.slane %v453_v26, 1  ;;  %v726_v54 = vrot.slane %v725_v43, 2  ;;  %v498_v58 = vadd.f32 %v497_v35, %v496_v16  ;;  %v509_v59 = vrot.slane %v508_v36, 2 }
  0xa1   : > { %v465_v0 = vadd.f32 %v464_v27, %v463_v14  ;;  %v460_v37 = vrot.slane %v459_v30, 1  ;;  %v1196_v1 = vpop.eup %1195  ;;  %v731_v60 = vadd.f32 %v1194_v21, %v730_v56  ;;  %v766_v63 = vadd.f32 %v765_v24, %v764_v25 }
  0xa2   : > { %v455_v44 = vadd.f32 %v454_v34, %v453_v26  ;;  %v727_v6 = vadd.f32 %v726_v54, %v725_v43  ;;  %v736_v61 = vrot.slane %v1196_v1, 4  ;;  %v504_v7 = vadd.f32 %v503_v50, %v502_v28 }
  0xa3   : > { %v466_v47 = vrot.slane %v465_v0, 1  ;;  %v461_v53 = vadd.f32 %v460_v37, %v459_v30  ;;  %v769_v11 = vrot.slane %v1727_v19, 4  ;;  %v732_v12 = vrot.slane %v731_v60, 2 }
  0xa4   : > { %1197 = vrcp.f32 %v455_v44  ;;  %v728_v4 = vrot.slane %v727_v6, 1  ;;  %v737_v13 = vadd.f32 %v1196_v1, %v736_v61  ;;  %v510_v14 = vadd.f32 %v509_v59, %v508_v36 }
  0xa5   : > { %v467_v57 = vadd.f32 %v466_v47, %v465_v0  ;;  %1199 = vrcp.f32 %v461_v53  ;;  %v770_v17 = vadd.f32 %v769_v11, %v1727_v19  ;;  %v775_v16 = vrot.slane %v1730_v23, 4 }
  0xa6   : > { %v729_v26 = vadd.f32 %v728_v4, %v727_v6  ;;  %v733_v27 = vadd.f32 %v732_v12, %v731_v60  ;;  %v738_v29 = vrot.slane %v737_v13, 2  ;;  %v499_v30 = vrot.slane %v498_v58, 1 }
  0xa7   : > { %1201 = vrcp.f32 %v467_v57  ;;  %v771_v33 = vrot.slane %v770_v17, 2  ;;  %v776_v25 = vadd.f32 %v775_v16, %v1730_v23  ;;  %v781_v28 = vrot.slane %v1746_v39, 4 }
  0xa8   : > { %1203 = vlog2.f32 %v455_v44  ;;  %v767_v21 = vrot.slane %v766_v63, 1  ;;  %v505_v34 = vrot.slane %v504_v7, 1  ;;  %v734_v0 = vrot.slane %v733_v27, 1 }
  0xa9   : > { %1205 = vlog2.f32 %v461_v53  ;;  %v739_v35 = vadd.f32 %v738_v29, %v737_v13  ;;  %v772_v36 = vadd.f32 %v771_v33, %v770_v17  ;;  %v777_v37 = vrot.slane %v776_v25, 2 }
  0xaa   : > { %1207 = vlog2.f32 %v467_v57  ;;  %v782_v19 = vadd.f32 %v781_v28, %v1746_v39  ;;  %v1792_v43 = vadd.f32 %v755_v40, %v1776_v22  ;;  %v511_v1 = vrot.slane %v510_v14, 1 }
  0xab   : > { %1209 = vlog2.f32 %v729_v26  ;;  %v735_v44 = vadd.f32 %v734_v0, %v733_v27  ;;  %v740_v47 = vrot.slane %v739_v35, 1  ;;  %v1794_v50 = vadd.f32 %v761_v51, %v760_v32 }
  0xac   : > { %v482_v23 = vadd.f32 %v481_v41, %v1771_v15  ;;  %v773_v53 = vrot.slane %v772_v36, 1  ;;  %v778_v54 = vadd.f32 %v777_v37, %v776_v25  ;;  %v783_v39 = vrot.slane %v782_v19, 2 }
  0xad   : > { %v741_v59 = vadd.f32 %v740_v47, %v739_v35  ;;  %1211 = vlog2.f32 %v735_v44  ;;  %v1803_v6 = vadd.f32 %v767_v21, %v766_v63  ;;  %v500_v32 = vadd.f32 %v499_v30, %v498_v58 }
  0xae   : > { %v1198_v24 = vpop.eup %1197  ;;  %v506_v51 = vadd.f32 %v505_v34, %v504_v7  ;;  %v1810_v12 = vadd.f32 %v773_v53, %v772_v36  ;;  %v784_v17 = vadd.f32 %v783_v39, %v782_v19 }
  0xaf   : > { %v1200_v56 = vpop.eup %1199  ;;  %v597_v57 = vmul.f32 %v1198_v24, %v585_v49  ;;  %v512_v49 = vadd.f32 %v511_v1, %v510_v14  ;;  %1213 = vlog2.f32 %v741_v59 }
  0xb0   : > { %v598_v40 = vmul.f32 %v1200_v56, %v589_v62  ;;  %v779_v62 = vrot.slane %v778_v54, 1  ;;  %v785_v47 = vrot.slane %v784_v17, 1 }
  0xb1   : > { %v1202_v22 = vpop.eup %1201  ;;  %v603_v60 = vrot.slane %v597_v57, %v1677_v31 }
  0xb2   : > { %v1204_v15 = vpop.eup %1203  ;;  %v599_v41 = vmul.f32 %v1202_v22, %v593_v9  ;;  %v607_v11 = vrot.slane %v598_v40, %v1677_v31 }
  0xb3   : > { %v1206_v61 = vpop.eup %1205  ;;  %v469_v4 = vmul.f32 0.6931472, %v1204_v15  ;;  %v612_v7 = vmul.f32 %v1751_v48, %v603_v60  ;;  %v786_v15 = vadd.f32 %v785_v47, %v784_v17 }
  0xb4   : > { %v1208_v63 = vpop.eup %1207  ;;  %v611_v58 = vrot.slane %v599_v41, %v1677_v31  ;;  %v471_v13 = vmul.f32 0.6931472, %v1206_v61  ;;  %v613_v38 = vmul.f32 %v1755_v52, %v607_v11 }
  0xb5   : > { %v473_v9 = vmul.f32 0.6931472, %v1208_v63  ;;  %v513_v16 = vsub.f32 %v469_v4, %v482_v23  ;;  %v544_v14 = vmul.f32 8.0, %v469_v4  ;;  %v616_v27 = vmul.f32 %v1706_v2, %v612_v7  ;;  %v1210_v33 = vpop.eup %1209 }
  0xb6   : > { %v614_v26 = vmul.f32 %v1759_v55, %v611_v58  ;;  %v514_v29 = vsub.f32 %v471_v13, %v1774_v18  ;;  %v545_v30 = vmul.f32 8.0, %v471_v13  ;;  %v627_v25 = vadd.f32 %v613_v38, %v612_v7 }
  0xb7   : > { %v617_v28 = vmul.f32 %v1709_v3, %v613_v38  ;;  %v515_v48 = vsub.f32 %v473_v9, %v1780_v20  ;;  %v546_v21 = vmul.f32 8.0, %v473_v9  ;;  %v547_v0 = vsub.f32 %v544_v14, %v500_v32  ;;  %v1212_v19 = vpop.eup %1211 }
  0xb8   : > { %v618_v34 = vmul.f32 %v1715_v8, %v614_v26  ;;  %v519_v52 = vcombine.low %v513_v16, %v514_v29  ;;  %v548_v35 = vsub.f32 %v545_v30, %v506_v51  ;;  %v628_v36 = vadd.f32 %v627_v25, %v614_v26 }
  0xb9   : > { %v619_v37 = vadd.f32 %v617_v28, %v616_v27  ;;  %v533_v55 = vrot.slane %v515_v48, %v1657_v10  ;;  %v549_v2 = vsub.f32 %v546_v21, %v512_v49  ;;  %v743_v44 = vmul.f32 0.6931472, %v1210_v33  ;;  %v1214_v23 = vpop.eup %1213 }
  0xba   : > { %v526_v18 = vrot.slane %v519_v52, %v1657_v10  ;;  %v553_v1 = vcombine.low %v547_v0, %v548_v35  ;;  %629 = vadd.xlane.f32.xlu0 %v628_v36  ;;  %v745_v24 = vmul.f32 0.6931472, %v1212_v19  ;;  %v780_v8 = vadd.f32 %v779_v62, %v778_v54 }
  0xbb   : > { %v620_v3 = vadd.f32 %v619_v37, %v618_v34  ;;  %v567_v20 = vrot.slane %v549_v2, %v1657_v10  ;;  %v787_v57 = vsub.f32 %v743_v44, %v1792_v43  ;;  %v818_v59 = vmul.f32 8.0, %v743_v44 }
  0xbc   : > { %v534_v53 = vcombine.low %v526_v18, %v533_v55  ;;  %v560_v56 = vrot.slane %v553_v1, %v1657_v10  ;;  %v747_v39 = vmul.f32 0.6931472, %v1214_v23  ;;  %v788_v22 = vsub.f32 %v745_v24, %v1794_v50 }
  0xbd   : > { %v819_v40 = vmul.f32 8.0, %v745_v24  ;;  %v821_v41 = vsub.f32 %v818_v59, %v1810_v12  ;;  %v626_v59 = vld [vmem:[#allocation3] sm:$0xff] }
  0xbe   : > { %v541_v32 = vrot.slane %v534_v53, %v1657_v10  ;;  %v568_v51 = vcombine.low %v560_v56, %v567_v20  ;;  %621 = vadd.xlane.f32.xlu0 %v620_v3  ;;  %v789_v54 = vsub.f32 %v747_v39, %v1803_v6  ;;  %v793_v60 = vcombine.low %v787_v57, %v788_v22 }
  0xbf   : > { %v820_v49 = vmul.f32 8.0, %v747_v39  ;;  %v822_v61 = vsub.f32 %v819_v40, %v780_v8  ;;  %v615_v40 = vld [vmem:[#allocation2] sm:$0xff] }
  0xc0   : > { %v543_v43 = vsel %vm1686_vm4, %v541_v32, 0.0  ;;  %v575_v11 = vrot.slane %v568_v51, %v1657_v10  ;;  %v800_v12 = vrot.slane %v793_v60, %v1657_v10  ;;  %v807_v63 = vrot.slane %v789_v54, %v1657_v10 }
  0xc1   : > { %v645_v50 = vrot.slane %v543_v43, %v1677_v31  ;;  %v649_v4 = vrot.slane %v543_v43, %v1684_v42  ;;  %v653_v62 = vrot.slane %v543_v43, %v1691_v46  ;;  %v823_v58 = vsub.f32 %v820_v49, %v786_v15  ;;  %v640_v15 = vld [vmem:[#allocation5] sm:$0x1]  ;;  %v668_v49 = vld [vmem:[#allocation6] sm:$0x1] }
  0xc2   : > { %v577_v6 = vsel %vm1686_vm4, %v575_v11, 0.0  ;;  %v827_v7 = vcombine.low %v821_v41, %v822_v61  ;;  %v808_v27 = vcombine.low %v800_v12, %v807_v63  ;;  %v852_v11 = vld [vmem:[#allocation7] sm:$0x1]  ;;  %v878_v12 = vld [vmem:[#allocation8] sm:$0x1] }
  0xc3   : > { %v658_v13 = vsel %vm657_vm8, %v645_v50, 0.0  ;;  %v659_v17 = vsel %vm657_vm8, %v649_v4, 0.0  ;;  %v661_v38 = vsel %vm657_vm8, %v653_v62, 0.0  ;;  %v673_v9 = vrot.slane %v577_v6, %v1677_v31 }
  0xc4   : > { %v660_v16 = vadd.f32 %v659_v17, %v658_v13  ;;  %v677_v14 = vrot.slane %v577_v6, %v1684_v42  ;;  %v681_v26 = vrot.slane %v577_v6, %v1691_v46  ;;  %v834_v30 = vrot.slane %v827_v7, %v1657_v10 }
  0xc5   : > { %v685_v29 = vsel %vm657_vm8, %v673_v9, 0.0  ;;  %v841_v33 = vrot.slane %v823_v58, %v1657_v10  ;;  %v815_v21 = vrot.slane %v808_v27, %v1657_v10 }
  0xc6   : > { %v662_v25 = vadd.f32 %v661_v38, %v660_v16  ;;  %v686_v28 = vsel %vm657_vm8, %v677_v14, 0.0  ;;  %v688_v48 = vsel %vm657_vm8, %v681_v26, 0.0 }
  0xc7   : > { %v687_v34 = vadd.f32 %v686_v28, %v685_v29  ;;  %v842_v52 = vcombine.low %v834_v30, %v841_v33  ;;  %v817_v0 = vsel %vm1686_vm4, %v815_v21, 0.0 }
  0xc8   : > { %663 = vadd.xlane.f32.xlu1 %v662_v25  ;;  %v857_v36 = vrot.slane %v817_v0, %v1677_v31  ;;  %v861_v37 = vrot.slane %v817_v0, %v1684_v42  ;;  %v865_v55 = vrot.slane %v817_v0, %v1691_v46 }
  0xc9   : > { %v689_v35 = vadd.f32 %v688_v48, %v687_v34  ;;  %v849_v2 = vrot.slane %v842_v52, %v1657_v10 }
  0xca   : > { %v869_v19 = vsel %vm657_vm8, %v857_v36, 0.0  ;;  %v870_v18 = vsel %vm657_vm8, %v861_v37, 0.0  ;;  %v872_v1 = vsel %vm657_vm8, %v865_v55, 0.0 }
  0xcb   : > { %690 = vadd.xlane.f32.xlu0 %v689_v35  ;;  %v871_v44 = vadd.f32 %v870_v18, %v869_v19  ;;  %v851_v47 = vsel %vm1686_vm4, %v849_v2, 0.0 }
  0xcc   : > { %v883_v3 = vrot.slane %v851_v47, %v1677_v31  ;;  %v887_v20 = vrot.slane %v851_v47, %v1684_v42  ;;  %v891_v24 = vrot.slane %v851_v47, %v1691_v46  ;;  %v633_v31 = vld [vmem:[#allocation4] sm:$0xff] }
  0xcd   : > { %v873_v8 = vadd.f32 %v872_v1, %v871_v44 }
  0xce   : > { %v895_v10 = vsel %vm657_vm8, %v883_v3, 0.0  ;;  %v896_v23 = vsel %vm657_vm8, %v887_v20, 0.0  ;;  %v898_v53 = vsel %vm657_vm8, %v891_v24, 0.0 }
  0xcf   : > { %874 = vadd.xlane.f32.xlu1 %v873_v8  ;;  %v897_v56 = vadd.f32 %v896_v23, %v895_v10 }
  0xd1   : > { %v899_v57 = vadd.f32 %v898_v53, %v897_v56 }
  0xd3   : > { %900 = vadd.xlane.f32.xlu0 %v899_v57 }
 0x11e   : > { %v637_v42 = vpop.xlane.xlu1 %636 }
 0x11f   : > { %v638_v45 = vadd.f32 %v637_v42, %v633_v31 }
 0x121   : > { %639 = vst.msk [vmem:[#allocation4] sm:$0xff] %vm336_vm0, %v638_v45 }
 0x128   : > { %v915_v46 = vld [vmem:[#allocation4] sm:$0xff] }
 0x129   : > { %916 = vst.msk [vmem:[%s1640_s18 + $0x10] sm:$0xff] %vm336_vm0, %v915_v46 }
 0x147   : > { %v630_v39 = vpop.xlane.xlu0 %629 }
 0x148   : > { %v631_v22 = vadd.f32 %v630_v39, %v626_v59 }
 0x14a   : > { %632 = vst.msk [vmem:[#allocation3] sm:$0xff] %vm336_vm0, %v631_v22 }
 0x14b   : > { %v622_v32 = vpop.xlane.xlu0 %621 }
 0x14c   : > { %v623_v51 = vadd.f32 %v622_v32, %v615_v40 }
 0x14e   : > { %625 = vst.msk [vmem:[#allocation2] sm:$0xff] %vm336_vm0, %v623_v51 }
 0x151   : > { %v913_v5 = vld [vmem:[#allocation3] sm:$0xff] }
 0x152   : > { %914 = vst.msk [vmem:[%s1640_s18 + $0x8] sm:$0xff] %vm336_vm0, %v913_v5 }
 0x155   : > { %v664_v41 = vpop.xlane.xlu1 %663  ;;  %v911_v54 = vld [vmem:[#allocation2] sm:$0xff] }
 0x156   : > { %v665_v60 = vadd.f32 %v664_v41, %v640_v15  ;;  %912 = vst.msk [vmem:[%s1640_s18] sm:$0xff] %vm336_vm0, %v911_v54 }
 0x158   : > { %667 = vst.msk [vmem:[#allocation5] sm:$0x1] %vm340_vm9, %v665_v60  ;;  %v691_v61 = vpop.xlane.xlu0 %690 }
 0x159   : > { %v692_v43 = vadd.f32 %v691_v61, %v668_v49 }
 0x15b   : > { %693 = vst.msk [vmem:[#allocation6] sm:$0x1] %vm340_vm9, %v692_v43 }
 0x15c   : > { %v875_v50 = vpop.xlane.xlu1 %874 }
 0x15d   : > { %v876_v4 = vadd.f32 %v875_v50, %v852_v11 }
 0x15f   : > { %v917_v62 = vld [vmem:[#allocation5] sm:$0x1]  ;;  %877 = vst.msk [vmem:[#allocation7] sm:$0x1] %vm340_vm9, %v876_v4 }
 0x160   : > { %918 = vst.msk [vmem:[%s1640_s18 + $0x18] sm:$0x1] %vm340_vm9, %v917_v62  ;;  %v901_v6 = vpop.xlane.xlu0 %900 }
 0x161   : > { %v902_v58 = vadd.f32 %v901_v6, %v878_v12 }
 0x162   : > { %v919_v63 = vld [vmem:[#allocation6] sm:$0x1] }
 0x163   : > { %920 = vst.msk [vmem:[%s1640_s18 + $0x19] sm:$0x1] %vm340_vm9, %v919_v63  ;;  %903 = vst.msk [vmem:[#allocation8] sm:$0x1] %vm340_vm9, %v902_v58 }
 0x166   : > { %v921_v7 = vld [vmem:[#allocation7] sm:$0x1] }
 0x167   : > { %922 = vst.msk [vmem:[%s1640_s18 + $0x1a] sm:$0x1] %vm340_vm9, %v921_v7 }
 0x16a   : > { %v923_v13 = vld [vmem:[#allocation8] sm:$0x1] }
 0x16b   : > { %924 = vst.msk [vmem:[%s1640_s18 + $0x1b] sm:$0x1] %vm340_vm9, %v923_v13 }
 0x16c   : > { %1318 = shalt.err (!%p1315_p13)
}
 0x16d   : > { %s1319_s26 = scalar_lea.hbm %s1901_s22, 512  ;;  %s1323_s7 = scalar_lea.hbm %s1957_s3, 1024 }
 0x16e   : > { %p1320_p11 = scmp.ne.s32.totalorder %s1901_s22, %s1319_s26  ;;  %p1324_p5 = scmp.lt.u32.totalorder %s1901_s22, %s1957_s3 }
 0x16f   : > { %p1325_p3 = scmp.lt.u32.totalorder %s1323_s7, %s1319_s26  ;;  %p1327_p0 = scmp.lt.u32.totalorder %s1319_s26, %s1901_s22 }
 0x170   : > { %p1321_p1 = pnand %p1320_p11, %p1978_p6 }
 0x171   : > { %p1326_p2 = por %p1325_p3, %p1324_p5 }
 0x172   : > { %p1322_p7 = pneg %p1321_p1 }
 0x173   : > { %p1328_p12 = por %p1327_p0, %p1326_p2 }
 0x175   : > { %p1329_p4 = pnand %p1328_p12, %p1322_p7 }
 0x177   : > { %1332 = shalt.err (!%p1329_p4)
}
 0x178   : > { %s1401_s11 = smov 128   ;;  %s1402_s19 = smov 8  }
 0x179   : > { %1113 = dma.vmem_to_hbm [thread:$0]  (%p1978_p6), %s1903_s30, 512, %s1901_s22, %s926_s8, %s1401_s11, %s1401_s11, %s1402_s19  }
 0x17a PF: > { %s956_s23 = sand.u32 1, %s1371_s12   ;;  %p1979_p8 = scmp.ne.s32.totalorder %s1969_s27, 0 }
 0x17b   : > { %p1980_p9 = scmp.ge.s32.totalorder %s1391_s17, 2  ;;  %s957_s18 = scalar_lea.sflag [#allocation11], %s956_s23 }
 0x17d   : > { %p1126_p10 = pnand %p1980_p9, %p1979_p8 }
 0x17f   : > { %1366 = dma.done.wait (!%p1126_p10), %s957_s18, 512  }
 0x180   : > { %1368 = vsyncadd (!%p1126_p10), %s957_s18, 4294966784  ;;  %s22_s17 = sadd.s32 1, %s1391_s17   ;;  %s1981_s24 = sld [smem:[#allocation19_spill]] }
 0x181   : > { %p19_p13 = scmp.ge.s32.totalorder %s22_s17, 4   ;;  %s1982_s14 = sld [smem:[#allocation21_spill]] }
 0x182   : > { %s1983_s25 = sld [smem:[#allocation20_spill]]  ;;  %s1984_s12 = smov %s1375_s13 }
 0x183   : > { %s1986_s15 = smov %s1387_s16  ;;  %21 = sbr.rel (!%p19_p13) target bundleno = 10 (0xa), region = 109 }
 0x186   : > { %s1985_s13 = smov %s1981_s24 }
 0x188   : > { %s1987_s16 = smov %s1983_s25 }
 0x18a   :  { %962 = vsyncpa [#allocation10], 1 }
 0x18b   :  { %964 = vsyncpa [#allocation10 + $0x1], 1 }
 0x18c   :  { %965 = vsyncpa [#allocation13], 1 }
 0x18d   :  { %967 = vsyncpa [#allocation13 + $0x1], 1 }
 0x18e   :  { %968 = vsyncpa [#allocation11], 1 }
 0x18f   :  { %970 = vsyncpa [#allocation11 + $0x1], 1 }

</bundles_post_ra>
